<compile_context>
chip_gen: v7x
topology: tpu7x:2x2x1
jax: 0.10.0
libtpu: 0.0.40
codegen_flags: <defaults>
</compile_context>

<pallas_src>
import numpy as np
import jax
import jax.numpy as jnp
from jax.experimental import pallas as pl
from jax.experimental.pallas import tpu as pltpu

L0 = 512          # split_size = conv-branch input length
L1 = L0 - 2       # 510 after Conv1d(1, 8, k=3)
L2 = L1 - 2       # 508 after Conv1d(8, 64, k=3)
POOL_OUT = 64     # AdaptiveAvgPool2d((1, 64)) width
NEG = -1.0e30     # bias for the padded (unused) logit lanes


# ---------------------------------------------------------------------------
# Pallas kernels
# ---------------------------------------------------------------------------
def mlp_kernel(x_ref, we_ref, be_ref, w1_ref, b1_ref, w2_ref, b2_ref, out_ref):
    """Stand-in extractor (Linear 256->256 + ReLU) followed by
    fc = Linear(256,512)+ReLU, Linear(512,1024)+ReLU."""
    x = x_ref[...]                                                     # (B, 256)
    h = jnp.maximum(jnp.dot(x, we_ref[...],
                            preferred_element_type=jnp.float32) + be_ref[...], 0.0)
    h = jnp.maximum(jnp.dot(h, w1_ref[...],
                            preferred_element_type=jnp.float32) + b1_ref[...], 0.0)
    h = jnp.maximum(jnp.dot(h, w2_ref[...],
                            preferred_element_type=jnp.float32) + b2_ref[...], 0.0)
    out_ref[...] = h                                                   # (B, 1024)


def branches_kernel(x_ref, w1_ref, s1_ref, h1_ref, w2_ref, s2_ref, h2_ref,
                    pfc_ref, bfc_ref, out_ref):
    """One parameter set (classify or discriminator) applied to all 2B feature
    rows, which the wrapper flattened into one padded lane row (1, 2B*512+256)."""
    N = out_ref.shape[1]              # number of stacked samples (= 2B)
    NL = N * L0                       # flattened valid length (lane multiple)
    Y1W = NL + 128                    # conv1 working width (lane multiple)

    xp = x_ref[...]                                       # (1, NL + 256)
    w1 = w1_ref[...].reshape(3, 8, 1)                     # conv1 taps
    s1 = s1_ref[...].reshape(8, 1)
    h1 = h1_ref[...].reshape(8, 1)

    # Conv1d(1, 8, k=3) + folded BN + ReLU for all samples at once.
    # Columns t in {510, 511} of each per-sample 512-block are finite garbage
    # (cross-sample taps); they are killed later by zero rows of pfc.
    y1 = (w1[0] * xp[:, 0:Y1W]
          + w1[1] * xp[:, 1:1 + Y1W]
          + w1[2] * xp[:, 2:2 + Y1W])                      # (8, Y1W)
    y1 = jnp.maximum(y1 * s1 + h1, 0.0)

    # im2col for Conv1d(8, 64, k=3): stack the 3 shifted views so the second
    # conv becomes a single K=24 MXU matmul over every sample.
    y1cat = jnp.concatenate(
        [y1[:, 0:NL], y1[:, 1:1 + NL], y1[:, 2:2 + NL]], axis=0)     # (24, NL)
    w2 = w2_ref[...].reshape(64, 24)                       # [o, j*8 + c]
    y2 = jnp.dot(w2, y1cat, preferred_element_type=jnp.float32)      # (64, NL)
    y2 = jnp.maximum(y2 * s2_ref[...].reshape(64, 1)
                     + h2_ref[...].reshape(64, 1), 0.0)

    # AdaptiveAvgPool2d((1, 64)): mean over the 64 conv channels first
    # (sublane reduce), then adaptive pooling + Linear(64, 4) folded into a
    # single zero-padded (512, 128) matrix per sample.
    mean_c = jnp.mean(y2, axis=0, keepdims=True)           # (1, NL)
    pfc = pfc_ref[...].reshape(L0, 128)
    bfc = bfc_ref[...].reshape(1, 128)                     # lanes 4..127 = NEG

    for n in range(N):                                     # unrolled, tiny dots
        logits = jnp.dot(mean_c[:, n * L0:(n + 1) * L0], pfc,
                         preferred_element_type=jnp.float32) + bfc   # (1, 128)
        m = jnp.max(logits, axis=1, keepdims=True)
        z = logits - m
        lse = jnp.log(jnp.sum(jnp.exp(z), axis=1, keepdims=True))
        out_ref[:, n:n + 1, :] = (z - lse)[:, None, :]     # lane-dense store


# ---------------------------------------------------------------------------
# Wrappers (pallas_call plumbing)
# ---------------------------------------------------------------------------
def mlp_forward(x_flat, p):
    we, be, w1, b1, w2, b2 = p
    B = x_flat.shape[0]
    return pl.pallas_call(
        mlp_kernel,
        out_shape=jax.ShapeDtypeStruct((B, 1024), jnp.float32),
        in_specs=[pl.BlockSpec(memory_space=pltpu.MemorySpace.VMEM)] * 7,
        out_specs=pl.BlockSpec(memory_space=pltpu.MemorySpace.VMEM),
    )(x_flat, we, be, w1, b1, w2, b2)


def branches_forward(xp, N, bp):
    """xp: (1, N*512 + 256) flattened features; returns (2, N, 128) log-probs
    (first 4 lanes valid) — grid step p = parameter set (0=classify, 1=disc)."""
    w1s, s1s, h1s, w2s, s2s, h2s, pfcs, bfcs = bp
    XP = xp.shape[1]
    return pl.pallas_call(
        branches_kernel,
        out_shape=jax.ShapeDtypeStruct((2, N, 128), jnp.float32),
        grid=(2,),
        in_specs=[
            pl.BlockSpec((1, XP), lambda p: (0, 0)),            # flattened feats
            pl.BlockSpec((1, 3, 8, 1), lambda p: (p, 0, 0, 0)),  # conv1 taps
            pl.BlockSpec((1, 8, 1), lambda p: (p, 0, 0)),        # bn1 scale
            pl.BlockSpec((1, 8, 1), lambda p: (p, 0, 0)),        # bn1 shift
            pl.BlockSpec((1, 64, 24), lambda p: (p, 0, 0)),      # conv2 im2col W
            pl.BlockSpec((1, 64, 1), lambda p: (p, 0, 0)),       # bn2 scale
            pl.BlockSpec((1, 64, 1), lambda p: (p, 0, 0)),       # bn2 shift
            pl.BlockSpec((1, L0, 128), lambda p: (p, 0, 0)),     # pool @ fc (padded)
            pl.BlockSpec((1, 1, 128), lambda p: (p, 0, 0)),      # fc bias (padded)
        ],
        out_specs=pl.BlockSpec((1, N, 128), lambda p: (p, 0, 0)),
        compiler_params=pltpu.CompilerParams(dimension_semantics=("parallel",)),
    )(xp, w1s, s1s, h1s, w2s, s2s, h2s, pfcs, bfcs)


def fgan_forward(x, alpha, params):
    """Mirrors FGANModel.forward. `alpha` only affects the backward pass of
    ReverseLayerF (gradient reversal), so the forward output does not use it."""
    del alpha
    B = x.shape[0]
    x_flat = x.reshape(B, -1).astype(jnp.float32)
    feat = mlp_forward(x_flat, params["mlp"])                 # (B, 1024)
    iml, uml = feat[:, :L0], feat[:, L0:]                     # split_size = 512

    # Stack [iml; uml] and flatten all 2B samples onto the lane axis.
    sig = jnp.concatenate([iml, uml], axis=0)                 # (2B, 512)
    N = 2 * B
    xp = jnp.pad(sig.reshape(1, N * L0), ((0, 0), (0, 256)))  # (1, N*512 + 256)

    out = branches_forward(xp, N, params["branches"])         # (2, 2B, 128)
    cls, dsc = out[0, :, :4], out[1, :, :4]
    true_class_out = cls[B:]        # classify(uml)
    false_class_out = cls[:B]       # classify(iml)      (reversed_iml == iml fwd)
    true_iml_out = dsc[:B]          # discriminator(iml)
    false_iml_out = dsc[B:]         # discriminator(uml) (reversed_uml == uml fwd)
    return true_class_out, false_class_out, true_iml_out, false_iml_out


# ---------------------------------------------------------------------------
# Pure-JAX reference (same parameters) for a correctness check
# ---------------------------------------------------------------------------
def ref_mlp(x_flat, p):
    we, be, w1, b1, w2, b2 = p
    h = jnp.maximum(x_flat @ we + be, 0.0)
    h = jnp.maximum(h @ w1 + b1, 0.0)
    return jnp.maximum(h @ w2 + b2, 0.0)


def ref_branch(feat, p):
    w1, s1, h1, w2, s2, h2, pool, wfc, bfc = p
    B = feat.shape[0]
    y1 = jnp.zeros((B, 8, L1), jnp.float32)
    for j in range(3):
        y1 = y1 + feat[:, None, j:j + L1] * w1[j][None, :, :]
    y1 = jnp.maximum(y1 * s1[None] + h1[None], 0.0)
    y2 = jnp.zeros((B, 64, L2), jnp.float32)
    for j in range(3):
        y2 = y2 + jnp.einsum("oc,bcl->bol", w2[j], y1[:, :, j:j + L2])
    y2 = jnp.maximum(y2 * s2[None] + h2[None], 0.0)
    mean_c = jnp.mean(y2, axis=1)                 # (B, 508)
    pooled = mean_c @ pool                        # (B, 64)
    logits = pooled @ wfc + bfc
    return jax.nn.log_softmax(logits, axis=1)


def fgan_forward_ref(x, alpha, params):
    del alpha
    B = x.shape[0]
    feat = ref_mlp(x.reshape(B, -1).astype(jnp.float32), params["mlp"])
    iml, uml = feat[:, :L0], feat[:, L0:]
    return (ref_branch(uml, params["classify"]),
            ref_branch(iml, params["classify"]),
            ref_branch(iml, params["discriminator"]),
            ref_branch(uml, params["discriminator"]))


# ---------------------------------------------------------------------------
# Deterministic parameter construction
# ---------------------------------------------------------------------------
def adaptive_avg_pool_matrix(in_len, out_len):
    """pool[t, i] = 1/|bin_i| if t in bin_i else 0  (PyTorch adaptive rule)."""
    mat = np.zeros((in_len, out_len), dtype=np.float32)
    for i in range(out_len):
        start = (i * in_len) // out_len
        end = ((i + 1) * in_len + out_len - 1) // out_len
        mat[start:end, i] = 1.0 / float(end - start)
    return jnp.asarray(mat)


def _init_mlp_params(key):
    ks = jax.random.split(key, 6)
    return (0.05 * jax.random.normal(ks[0], (256, 256), jnp.float32),
            0.05 * jax.random.normal(ks[1], (1, 256), jnp.float32),
            0.05 * jax.random.normal(ks[2], (256, 512), jnp.float32),
            0.05 * jax.random.normal(ks[3], (1, 512), jnp.float32),
            0.05 * jax.random.normal(ks[4], (512, 1024), jnp.float32),
            0.05 * jax.random.normal(ks[5], (1, 1024), jnp.float32))


def _init_branch_params(key):
    ks = jax.random.split(key, 14)
    eps = 1e-5
    conv1_w = 0.2 * jax.random.normal(ks[0], (8, 1, 3), jnp.float32)
    conv1_b = 0.1 * jax.random.normal(ks[1], (8,), jnp.float32)
    g1 = 1.0 + 0.1 * jax.random.normal(ks[2], (8,), jnp.float32)
    be1 = 0.1 * jax.random.normal(ks[3], (8,), jnp.float32)
    mu1 = 0.1 * jax.random.normal(ks[4], (8,), jnp.float32)
    var1 = jax.random.uniform(ks[5], (8,), jnp.float32, 0.5, 1.5)
    conv2_w = 0.1 * jax.random.normal(ks[6], (64, 8, 3), jnp.float32)
    conv2_b = 0.1 * jax.random.normal(ks[7], (64,), jnp.float32)
    g2 = 1.0 + 0.1 * jax.random.normal(ks[8], (64,), jnp.float32)
    be2 = 0.1 * jax.random.normal(ks[9], (64,), jnp.float32)
    mu2 = 0.1 * jax.random.normal(ks[10], (64,), jnp.float32)
    var2 = jax.random.uniform(ks[11], (64,), jnp.float32, 0.5, 1.5)
    fc_w = 0.1 * jax.random.normal(ks[12], (4, 64), jnp.float32)   # torch (out,in)
    fc_b = 0.1 * jax.random.normal(ks[13], (4,), jnp.float32)

    # fold eval-mode BatchNorm + conv bias into per-channel scale / shift
    s1 = g1 / jnp.sqrt(var1 + eps)
    h1 = (conv1_b - mu1) * s1 + be1
    s2 = g2 / jnp.sqrt(var2 + eps)
    h2 = (conv2_b - mu2) * s2 + be2

    w1k = jnp.transpose(conv1_w, (2, 0, 1))        # (3, 8, 1)  tap-major
    w2k = jnp.transpose(conv2_w, (2, 0, 1))        # (3, 64, 8) tap-major
    pool = adaptive_avg_pool_matrix(L2, POOL_OUT)  # (508, 64)
    return (w1k, s1.reshape(8, 1), h1.reshape(8, 1),
            w2k, s2.reshape(64, 1), h2.reshape(64, 1),
            pool, fc_w.T, fc_b.reshape(1, 4))


def _prepare_branch_params(p):
    """Fold / pad one parameter set into the kernel layout."""
    w1k, s1, h1, w2k, s2, h2, pool, wfc, bfc = p
    # im2col conv2 weight: W2r[o, j*8 + c] = conv2_w[o, c, j]
    w2r = jnp.transpose(w2k, (1, 0, 2)).reshape(64, 24)
    # fold adaptive pool @ fc, pad to lane-aligned (512, 128)
    pfc = jnp.pad(pool @ wfc, ((0, L0 - L2), (0, 128 - 4)))
    # padded bias: real classes in lanes 0..3, NEG elsewhere (-> ~0 prob mass)
    bfcp = jnp.full((1, 128), NEG, jnp.float32).at[0, :4].set(bfc[0])
    return w1k, s1, h1, w2r, s2, h2, pfc, bfcp


def _stack_branch_params(p_cls, p_dsc):
    a, b = _prepare_branch_params(p_cls), _prepare_branch_params(p_dsc)
    return tuple(jnp.stack([x, y], axis=0) for x, y in zip(a, b))


# ---------------------------------------------------------------------------
if __name__ == "__main__":
    key = jax.random.PRNGKey(0)
    kx, kmlp, kcls, kdisc = jax.random.split(key, 4)

    # input signal, PyTorch NCL convention: (batch=2, channels=4, length=64)
    x = jax.random.normal(kx, (2, 4, 64), jnp.float32)
    alpha = 0.5

    mlp_p = _init_mlp_params(kmlp)
    cls_p = _init_branch_params(kcls)
    dsc_p = _init_branch_params(kdisc)
    params = {
        "mlp": mlp_p,
        "classify": cls_p,
        "discriminator": dsc_p,
        "branches": _stack_branch_params(cls_p, dsc_p),
    }

    outs = fgan_forward(x, alpha, params)
    jax.block_until_ready(outs)

    refs = fgan_forward_ref(x, alpha, params)
    for o, r in zip(outs, refs):
        assert o.shape == (2, 4) and o.dtype == jnp.float32
        np.testing.assert_allclose(np.asarray(o), np.asarray(r),
                                   rtol=2e-3, atol=2e-3)

    print("KERNEL_OK")
</pallas_src>

<mosaic_0001>
module attributes {stable_mosaic.version = 11 : i64} {
  func.func @mlp_kernel(%arg0: memref<2x256xf32, #tpu.memory_space<vmem>>, %arg1: memref<256x256xf32, #tpu.memory_space<vmem>>, %arg2: memref<1x256xf32, #tpu.memory_space<vmem>>, %arg3: memref<256x512xf32, #tpu.memory_space<vmem>>, %arg4: memref<1x512xf32, #tpu.memory_space<vmem>>, %arg5: memref<512x1024xf32, #tpu.memory_space<vmem>>, %arg6: memref<1x1024xf32, #tpu.memory_space<vmem>>, %arg7: memref<2x1024xf32, #tpu.memory_space<vmem>>) attributes {dimension_semantics = [], scalar_prefetch = 0 : i64, scratch_operands = 0 : i64, tpu.core_type = #tpu.core_type<tc>} {
    %c0 = arith.constant 0 : index
    %c0_0 = arith.constant 0 : index
    %0 = vector.load %arg0[%c0, %c0_0] : memref<2x256xf32, #tpu.memory_space<vmem>>, vector<2x256xf32>
    %c0_1 = arith.constant 0 : index
    %c0_2 = arith.constant 0 : index
    %1 = vector.load %arg1[%c0_1, %c0_2] : memref<256x256xf32, #tpu.memory_space<vmem>>, vector<256x256xf32>
    %cst = arith.constant dense<0.000000e+00> : vector<2x256xf32>
    %2 = tpu.matmul %0, %1, %cst {dimension_numbers = #tpu.dot_dimension_numbers<[1], [0], [0], [1], [0, 0, 1, 1], [], []>} : vector<2x256xf32>, vector<256x256xf32>, vector<2x256xf32> -> vector<2x256xf32>
    %c0_3 = arith.constant 0 : index
    %c0_4 = arith.constant 0 : index
    %3 = vector.load %arg2[%c0_3, %c0_4] : memref<1x256xf32, #tpu.memory_space<vmem>>, vector<1x256xf32>
    %4 = vector.broadcast %3 : vector<1x256xf32> to vector<2x256xf32>
    %5 = arith.addf %2, %4 : vector<2x256xf32>
    %cst_5 = arith.constant 0.000000e+00 : f32
    %6 = vector.broadcast %cst_5 : f32 to vector<2x256xf32>
    %7 = arith.maximumf %5, %6 : vector<2x256xf32>
    %c0_6 = arith.constant 0 : index
    %c0_7 = arith.constant 0 : index
    %8 = vector.load %arg3[%c0_6, %c0_7] : memref<256x512xf32, #tpu.memory_space<vmem>>, vector<256x512xf32>
    %cst_8 = arith.constant dense<0.000000e+00> : vector<2x512xf32>
    %9 = tpu.matmul %7, %8, %cst_8 {dimension_numbers = #tpu.dot_dimension_numbers<[1], [0], [0], [1], [0, 0, 1, 1], [], []>} : vector<2x256xf32>, vector<256x512xf32>, vector<2x512xf32> -> vector<2x512xf32>
    %c0_9 = arith.constant 0 : index
    %c0_10 = arith.constant 0 : index
    %10 = vector.load %arg4[%c0_9, %c0_10] : memref<1x512xf32, #tpu.memory_space<vmem>>, vector<1x512xf32>
    %11 = vector.broadcast %10 : vector<1x512xf32> to vector<2x512xf32>
    %12 = arith.addf %9, %11 : vector<2x512xf32>
    %cst_11 = arith.constant 0.000000e+00 : f32
    %13 = vector.broadcast %cst_11 : f32 to vector<2x512xf32>
    %14 = arith.maximumf %12, %13 : vector<2x512xf32>
    %c0_12 = arith.constant 0 : index
    %c0_13 = arith.constant 0 : index
    %15 = vector.load %arg5[%c0_12, %c0_13] : memref<512x1024xf32, #tpu.memory_space<vmem>>, vector<512x1024xf32>
    %cst_14 = arith.constant dense<0.000000e+00> : vector<2x1024xf32>
    %16 = tpu.matmul %14, %15, %cst_14 {dimension_numbers = #tpu.dot_dimension_numbers<[1], [0], [0], [1], [0, 0, 1, 1], [], []>} : vector<2x512xf32>, vector<512x1024xf32>, vector<2x1024xf32> -> vector<2x1024xf32>
    %c0_15 = arith.constant 0 : index
    %c0_16 = arith.constant 0 : index
    %17 = vector.load %arg6[%c0_15, %c0_16] : memref<1x1024xf32, #tpu.memory_space<vmem>>, vector<1x1024xf32>
    %18 = vector.broadcast %17 : vector<1x1024xf32> to vector<2x1024xf32>
    %19 = arith.addf %16, %18 : vector<2x1024xf32>
    %cst_17 = arith.constant 0.000000e+00 : f32
    %20 = vector.broadcast %cst_17 : f32 to vector<2x1024xf32>
    %21 = arith.maximumf %19, %20 : vector<2x1024xf32>
    %c0_18 = arith.constant 0 : index
    %c0_19 = arith.constant 0 : index
    %22 = vector.load %arg7[%c0_18, %c0_19] : memref<2x1024xf32, #tpu.memory_space<vmem>>, vector<2x1024xf32>
    tpu.vector_store %arg7[%c0_18, %c0_19], %21 {strides = array<i32>} : memref<2x1024xf32, #tpu.memory_space<vmem>>, vector<2x1024xf32>,
    return
  }
}

</mosaic_0001>

<bundles_post_ra>
// kernel: tpu_custom_call.1
= control target key start
LH: loop header
LB: loop body
LE: loop exit
PB: predicated region body
PF: predicated region fallthrough
CT: control target
= control target key end

     0   :  { %12 = vsyncpa [#allocation3], 0  ;;  %s2905_s0 = inlined_call_operand.hbm [shape: f32[2,256], index: 0, kind: input, shape index: {}]   ;;  %s2906_s1 = inlined_call_operand.hbm [shape: f32[256,256], index: 1, kind: input, shape index: {}]   ;;  %s2907_s2 = inlined_call_operand.hbm [shape: f32[1,256], index: 2, kind: input, shape index: {}]   ;;  %s2908_s3 = inlined_call_operand.hbm [shape: f32[256,512], index: 3, kind: input, shape index: {}]   ;;  %s2909_s4 = inlined_call_operand.hbm [shape: f32[1,512], index: 4, kind: input, shape index: {}]   ;;  %s2910_s5 = inlined_call_operand.hbm [shape: f32[512,1024], index: 5, kind: input, shape index: {}]   ;;  %s2911_s6 = inlined_call_operand.hbm [shape: f32[1,1024], index: 6, kind: input, shape index: {}]   ;;  %s2912_s7 = inlined_call_operand.hbm [shape: f32[2,1024], index: 7, kind: output, shape index: {}]  }
   0x1   :  { %13 = vsyncpa [#allocation6], 0 }
   0x2   :  { %14 = vsyncpa [#allocation9], 0 }
   0x3   :  { %15 = vsyncpa [#allocation12], 0 }
   0x4   :  { %16 = vsyncpa [#allocation4], 0  ;;  %s2687_s24 = smov [#allocation5]   ;;  %s2501_s28 = scalar_lea.hbm %s2906_s1, 8192 }
   0x5   :  { %s32_s25 = sshll.u32 %s2687_s24, 4  ;;  %p2502_p0 = scmp.ne.s32.totalorder %s2906_s1, %s2501_s28  ;;  %s33_s25 = int_to_ptr.vmem [resolvable:$true] %s32_s25 }
   0x6   :  { %p2505_p1 = scmp.lt.u32.totalorder %s2501_s28, %s2906_s1 }
   0x8   :  { %p2507_p2 = pnand %p2505_p1, %p2502_p0 }
   0xa   :  { %2510 = shalt.err (!%p2507_p2)
}
   0xb   :  { %s2511_s10 = scalar_lea.vmem %s33_s25, 8192  ;;  %p2516_p4 = scmp.lt.s32.totalorder %s33_s25, %s33_s25 }
   0xc   :  { %p2512_p3 = scmp.ne.s32.totalorder %s33_s25, %s2511_s10  ;;  %p2517_p5 = scmp.lt.s32.totalorder %s2511_s10, %s2511_s10 }
   0xe   :  { %p2518_p6 = por %p2517_p5, %p2516_p4 }
  0x10   :  { %p2519_p7 = pnand %p2518_p6, %p2512_p3 }
  0x12   :  { %2522 = shalt.err (!%p2519_p7)
}
  0x13   :  { %s2688_s11 = smov 256   ;;  %s2689_s12 = smov 16  }
  0x14   :  { %38 = dma.hbm_to_vmem [thread:$0]  %s2906_s1, 8192, %s33_s25, [#allocation6], %s2688_s11, %s2688_s11, %s2689_s12  }
  0x15   :  { %s2690_s15 = smov [#allocation8]   ;;  %s2523_s19 = scalar_lea.hbm %s2908_s3, 16384 }
  0x16   :  { %s54_s16 = sshll.u32 %s2690_s15, 4  ;;  %p2524_p8 = scmp.ne.s32.totalorder %s2908_s3, %s2523_s19  ;;  %s55_s16 = int_to_ptr.vmem [resolvable:$true] %s54_s16 }
  0x17   :  { %p2527_p9 = scmp.lt.u32.totalorder %s2523_s19, %s2908_s3 }
  0x19   :  { %p2529_p10 = pnand %p2527_p9, %p2524_p8 }
  0x1b   :  { %2532 = shalt.err (!%p2529_p10)
}
  0x1c   :  { %s2533_s24 = scalar_lea.vmem %s55_s16, 16384  ;;  %p2538_p12 = scmp.lt.s32.totalorder %s55_s16, %s55_s16 }
  0x1d   :  { %p2534_p11 = scmp.ne.s32.totalorder %s55_s16, %s2533_s24  ;;  %p2539_p13 = scmp.lt.s32.totalorder %s2533_s24, %s2533_s24 }
  0x1f   :  { %p2540_p0 = por %p2539_p13, %p2538_p12 }
  0x21   :  { %p2541_p1 = pnand %p2540_p0, %p2534_p11 }
  0x23   :  { %2544 = shalt.err (!%p2541_p1)
}
  0x24   :  { %s2691_s1 = smov 512   ;;  %s2692_s25 = smov 32  }
  0x25   :  { %60 = dma.hbm_to_vmem [thread:$0]  %s2908_s3, 16384, %s55_s16, [#allocation9], %s2691_s1, %s2691_s1, %s2692_s25  }
  0x26   :  { %s2693_s28 = smov [#allocation11]   ;;  %s2545_s9 = scalar_lea.hbm %s2910_s5, 65536 }
  0x27   :  { %s76_s29 = sshll.u32 %s2693_s28, 4  ;;  %p2546_p2 = scmp.ne.s32.totalorder %s2910_s5, %s2545_s9  ;;  %s77_s29 = int_to_ptr.vmem [resolvable:$true] %s76_s29 }
  0x28   :  { %p2549_p3 = scmp.lt.u32.totalorder %s2545_s9, %s2910_s5 }
  0x2a   :  { %p2551_p4 = pnand %p2549_p3, %p2546_p2 }
  0x2c   :  { %2554 = shalt.err (!%p2551_p4)
}
  0x2d   :  { %s2555_s14 = scalar_lea.vmem %s77_s29, 65536  ;;  %p2560_p6 = scmp.lt.s32.totalorder %s77_s29, %s77_s29 }
  0x2e   :  { %p2556_p5 = scmp.ne.s32.totalorder %s77_s29, %s2555_s14  ;;  %p2561_p7 = scmp.lt.s32.totalorder %s2555_s14, %s2555_s14 }
  0x30   :  { %p2562_p8 = por %p2561_p7, %p2560_p6 }
  0x32   :  { %p2563_p9 = pnand %p2562_p8, %p2556_p5 }
  0x34   :  { %2566 = shalt.err (!%p2563_p9)
}
  0x35   :  { %s2694_s3 = smov 1024   ;;  %s2695_s15 = smov 64  }
  0x36   :  { %82 = dma.hbm_to_vmem [thread:$0]  %s2910_s5, 65536, %s77_s29, [#allocation12], %s2694_s3, %s2694_s3, %s2695_s15  }
  0x37   :  { %s2696_s18 = smov [#allocation2]   ;;  %s2697_s20 = smov [#allocation7]  }
  0x38   :  { %s23_s19 = sshll.u32 %s2696_s18, 4  ;;  %s45_s21 = sshll.u32 %s2697_s20, 4  ;;  %s24_s19 = int_to_ptr.vmem [resolvable:$true] %s23_s19  ;;  %s46_s21 = int_to_ptr.vmem [resolvable:$true] %s45_s21 }
  0x39   :  { %s2567_s24 = scalar_lea.hbm %s2905_s0, 64 }
  0x3a   :  { %p2568_p10 = scmp.ne.s32.totalorder %s2905_s0, %s2567_s24  ;;  %p2571_p11 = scmp.lt.u32.totalorder %s2567_s24, %s2905_s0 }
  0x3c   :  { %p2573_p12 = pnand %p2571_p11, %p2568_p10 }
  0x3e   :  { %2576 = shalt.err (!%p2573_p12)
}
  0x3f   :  { %s2577_s5 = scalar_lea.vmem %s24_s19, 64  ;;  %p2582_p0 = scmp.lt.s32.totalorder %s24_s19, %s24_s19 }
  0x40   :  { %p2578_p13 = scmp.ne.s32.totalorder %s24_s19, %s2577_s5  ;;  %p2583_p1 = scmp.lt.s32.totalorder %s2577_s5, %s2577_s5 }
  0x42   :  { %p2584_p2 = por %p2583_p1, %p2582_p0 }
  0x44   :  { %p2585_p3 = pnand %p2584_p2, %p2578_p13 }
  0x46   :  { %2588 = shalt.err (!%p2585_p3)
}
  0x47   :  { %26 = dma.hbm_to_vmem [thread:$0]  %s2905_s0, 64, %s24_s19, [#allocation3]  }
  0x48   :  { %s2589_s9 = scalar_lea.hbm %s2907_s2, 32 }
  0x49   :  { %p2590_p4 = scmp.ne.s32.totalorder %s2907_s2, %s2589_s9  ;;  %p2593_p5 = scmp.lt.u32.totalorder %s2589_s9, %s2907_s2 }
  0x4b   :  { %p2595_p6 = pnand %p2593_p5, %p2590_p4 }
  0x4d   :  { %2598 = shalt.err (!%p2595_p6)
}
  0x4e   :  { %s2599_s14 = scalar_lea.vmem %s46_s21, 32  ;;  %p2604_p8 = scmp.lt.s32.totalorder %s46_s21, %s46_s21 }
  0x4f   :  { %p2600_p7 = scmp.ne.s32.totalorder %s46_s21, %s2599_s14  ;;  %p2605_p9 = scmp.lt.s32.totalorder %s2599_s14, %s2599_s14 }
  0x51   :  { %p2606_p10 = por %p2605_p9, %p2604_p8 }
  0x53   :  { %p2607_p11 = pnand %p2606_p10, %p2600_p7 }
  0x55   :  { %2610 = shalt.err (!%p2607_p11)
}
  0x56   :  { %48 = dma.hbm_to_vmem [thread:$0]  %s2907_s2, 32, %s46_s21, [#allocation6]  }
  0x57   :  { %s2698_s15 = smov [#allocation10]   ;;  %s2699_s17 = smov [#allocation13]  }
  0x58   :  { %s67_s16 = sshll.u32 %s2698_s15, 4  ;;  %s89_s18 = sshll.u32 %s2699_s17, 4  ;;  %s68_s16 = int_to_ptr.vmem [resolvable:$true] %s67_s16  ;;  %s90_s18 = int_to_ptr.vmem [resolvable:$true] %s89_s18 }
  0x59   :  { %s2611_s22 = scalar_lea.hbm %s2909_s4, 64 }
  0x5a   :  { %p2612_p12 = scmp.ne.s32.totalorder %s2909_s4, %s2611_s22  ;;  %p2615_p13 = scmp.lt.u32.totalorder %s2611_s22, %s2909_s4 }
  0x5c   :  { %p2617_p0 = pnand %p2615_p13, %p2612_p12 }
  0x5e   :  { %2620 = shalt.err (!%p2617_p0)
}
  0x5f   :  { %s2621_s2 = scalar_lea.vmem %s68_s16, 64  ;;  %p2626_p2 = scmp.lt.s32.totalorder %s68_s16, %s68_s16 }
  0x60   :  { %p2622_p1 = scmp.ne.s32.totalorder %s68_s16, %s2621_s2  ;;  %p2627_p3 = scmp.lt.s32.totalorder %s2621_s2, %s2621_s2 }
  0x62   :  { %p2628_p4 = por %p2627_p3, %p2626_p2 }
  0x64   :  { %p2629_p5 = pnand %p2628_p4, %p2622_p1 }
  0x66   :  { %2632 = shalt.err (!%p2629_p5)
}
  0x67   :  { %70 = dma.hbm_to_vmem [thread:$0]  %s2909_s4, 64, %s68_s16, [#allocation9]  }
  0x68   :  { %s2633_s28 = scalar_lea.hbm %s2911_s6, 128 }
  0x69   :  { %p2634_p6 = scmp.ne.s32.totalorder %s2911_s6, %s2633_s28  ;;  %p2637_p7 = scmp.lt.u32.totalorder %s2633_s28, %s2911_s6 }
  0x6b   :  { %p2639_p8 = pnand %p2637_p7, %p2634_p6 }
  0x6d   :  { %2642 = shalt.err (!%p2639_p8)
}
  0x6e   :  { %s2643_s10 = scalar_lea.vmem %s90_s18, 128  ;;  %p2648_p10 = scmp.lt.s32.totalorder %s90_s18, %s90_s18 }
  0x6f   :  { %p2644_p9 = scmp.ne.s32.totalorder %s90_s18, %s2643_s10  ;;  %p2649_p11 = scmp.lt.s32.totalorder %s2643_s10, %s2643_s10 }
  0x71   :  { %p2650_p12 = por %p2649_p11, %p2648_p10 }
  0x73   :  { %p2651_p13 = pnand %p2650_p12, %p2644_p9 }
  0x75   :  { %2654 = shalt.err (!%p2651_p13)
}
  0x76   :  { %92 = dma.hbm_to_vmem [thread:$0]  %s2911_s6, 128, %s90_s18, [#allocation12]  }
  0x77   :  { %2677 = dma.done.wait [#allocation3], 64  }
  0x78   :  { %2678 = vsyncadd [#allocation3], 4294967232 }
  0x79   :  { %2679 = dma.done.wait [#allocation6], 8224  }
  0x7a   :  { %2680 = vsyncadd [#allocation6], 4294959072 }
  0x7b   :  { %2681 = dma.done.wait [#allocation9], 16448  }
  0x7c   :  { %2682 = vsyncadd [#allocation9], 4294950848 }
  0x7d   :  { %2683 = dma.done.wait [#allocation12], 65664  }
  0x7e   :  { %2684 = vsyncadd [#allocation12], 4294901632  ;;  %v116_v0 = vld [vmem:[#allocation5 + $0x8] sm:$0xff]  ;;  %v118_v1 = vld [vmem:[#allocation5 + $0x18] sm:$0xff]  ;;  %s2701_s6 = smov [#allocation14]  }
  0x7f   :  { %v115_v2 = vld [vmem:[#allocation5] sm:$0xff]  ;;  %v1766_v3 = vpack.c.bf16 %v118_v1, %v116_v0  ;;  %v117_v4 = vld [vmem:[#allocation5 + $0x10] sm:$0xff]  ;;  %v120_v5 = vld [vmem:[#allocation5 + $0x28] sm:$0xff]  ;;  %s1753_s12 = sshll.u32 %s2701_s6, 4  ;;  %s1754_s12 = int_to_ptr.vmem [resolvable:$true] %s1753_s12 }
  0x80   :  { %v122_v6 = vld [vmem:[#allocation5 + $0x38] sm:$0xff]  ;;  %v1768_v7 = vpack.c.bf16 %v117_v4, %v115_v2  ;;  %v119_v9 = vld [vmem:[#allocation5 + $0x20] sm:$0xff]  ;;  %v121_v10 = vld [vmem:[#allocation5 + $0x30] sm:$0xff]  ;;  %s2655_s13 = scalar_lea.vmem %s1754_s12, 256  ;;  %p2660_p1 = scmp.lt.s32.totalorder %s1754_s12, %s1754_s12 }
  0x81   :  { %v1770_v8 = vpack.c.bf16 %v122_v6, %v120_v5  ;;  %v124_v11 = vld [vmem:[#allocation5 + $0x48] sm:$0xff]  ;;  %1767 = vmatprep.subr.bf16.mxu0 %v1766_v3  ;;  %v126_v12 = vld [vmem:[#allocation5 + $0x58] sm:$0xff]  ;;  %v1772_v13 = vpack.c.bf16 %v121_v10, %v119_v9  ;;  %v123_v15 = vld [vmem:[#allocation5 + $0x40] sm:$0xff]  ;;  %p2656_p0 = scmp.ne.s32.totalorder %s1754_s12, %s2655_s13  ;;  %p2661_p2 = scmp.lt.s32.totalorder %s2655_s13, %s2655_s13 }
  0x82   :  { %1769 = vmatpush1.bf16.msra.mxu0 %v1768_v7  ;;  %v1774_v14 = vpack.c.bf16 %v126_v12, %v124_v11  ;;  %v125_v16 = vld [vmem:[#allocation5 + $0x50] sm:$0xff]  ;;  %v128_v17 = vld [vmem:[#allocation5 + $0x68] sm:$0xff]  ;;  %v130_v18 = vld [vmem:[#allocation5 + $0x78] sm:$0xff] }
  0x83   :  { %1771 = vmatprep.subr.bf16.mxu0 %v1770_v8  ;;  %v1776_v19 = vpack.c.bf16 %v125_v16, %v123_v15  ;;  %v1778_v20 = vpack.c.bf16 %v130_v18, %v128_v17  ;;  %v127_v21 = vld [vmem:[#allocation5 + $0x60] sm:$0xff]  ;;  %v129_v22 = vld [vmem:[#allocation5 + $0x70] sm:$0xff]  ;;  %v132_v23 = vld [vmem:[#allocation5 + $0x88] sm:$0xff]  ;;  %p2662_p3 = por %p2661_p2, %p2660_p1 }
  0x84   :  { %v134_v24 = vld [vmem:[#allocation5 + $0x98] sm:$0xff]  ;;  %v1780_v25 = vpack.c.bf16 %v129_v22, %v127_v21  ;;  %v131_v27 = vld [vmem:[#allocation5 + $0x80] sm:$0xff]  ;;  %v133_v28 = vld [vmem:[#allocation5 + $0x90] sm:$0xff] }
  0x85   :  { %v1782_v26 = vpack.c.bf16 %v134_v24, %v132_v23  ;;  %v136_v29 = vld [vmem:[#allocation5 + $0xa8] sm:$0xff]  ;;  %v138_v30 = vld [vmem:[#allocation5 + $0xb8] sm:$0xff]  ;;  %v1784_v31 = vpack.c.bf16 %v133_v28, %v131_v27  ;;  %v135_v33 = vld [vmem:[#allocation5 + $0xa0] sm:$0xff]  ;;  %p2663_p4 = pnand %p2662_p3, %p2656_p0 }
  0x86   :  { %1773 = vmatpush1.bf16.msra.mxu0 %v1772_v13  ;;  %v1786_v32 = vpack.c.bf16 %v138_v30, %v136_v29  ;;  %v137_v34 = vld [vmem:[#allocation5 + $0xb0] sm:$0xff]  ;;  %v140_v35 = vld [vmem:[#allocation5 + $0xc8] sm:$0xff]  ;;  %v142_v36 = vld [vmem:[#allocation5 + $0xd8] sm:$0xff] }
  0x87   :  { %1775 = vmatprep.subr.bf16.mxu0 %v1774_v14  ;;  %v1788_v37 = vpack.c.bf16 %v137_v34, %v135_v33  ;;  %v139_v38 = vld [vmem:[#allocation5 + $0xc0] sm:$0xff]  ;;  %v1790_v39 = vpack.c.bf16 %v142_v36, %v140_v35  ;;  %v141_v40 = vld [vmem:[#allocation5 + $0xd0] sm:$0xff]  ;;  %v2826_v41 = vld.sshfl [vmem:[#allocation2] sm:$0x33 pattern:$0x76325410] }
  0x88   :  { %v276_v42 = vld [vmem:[#allocation8 + $0x8] sm:$0xff]  ;;  %v146_v44 = vld [vmem:[#allocation5 + $0xf8] sm:$0xff]  ;;  %v199_v45 = vcombine.high %v2826_v41, %v2826_v41  ;;  %v275_v48 = vld [vmem:[#allocation8] sm:$0xff]  ;;  %v1792_v50 = vpack.c.bf16 %v141_v40, %v139_v38 }
  0x89   :  { %v144_v43 = vld [vmem:[#allocation5 + $0xe8] sm:$0xff]  ;;  %v143_v55 = vld [vmem:[#allocation5 + $0xe0] sm:$0xff]  ;;  %v145_v56 = vld [vmem:[#allocation5 + $0xf0] sm:$0xff] }
  0x8a   :  { %1777 = vmatpush1.bf16.msra.mxu0 %v1776_v19  ;;  %v280_v46 = vld [vmem:[#allocation8 + $0x28] sm:$0xff]  ;;  %v279_v49 = vld [vmem:[#allocation8 + $0x20] sm:$0xff]  ;;  %266 = vmatprep.mubr.f32.mxu0 %v199_v45  ;;  %v1794_v54 = vpack.c.bf16 %v146_v44, %v144_v43  ;;  %v150_v60 = vld [vmem:[#allocation5 + $0x118] sm:$0xff]  ;;  %v1796_v1 = vpack.c.bf16 %v145_v56, %v143_v55 }
  0x8b   :  { %1779 = vmatprep.subr.bf16.mxu0 %v1778_v20  ;;  %v1830_v47 = vpack.c.bf16 %v280_v46, %v276_v42  ;;  %v1832_v51 = vpack.c.bf16 %v279_v49, %v275_v48  ;;  %v284_v52 = vld [vmem:[#allocation8 + $0x48] sm:$0xff]  ;;  %v283_v58 = vld [vmem:[#allocation8 + $0x40] sm:$0xff]  ;;  %v154_v10 = vld [vmem:[#allocation5 + $0x138] sm:$0xff] }
  0x8c   :  { %v288_v53 = vld [vmem:[#allocation8 + $0x68] sm:$0xff]  ;;  %v287_v61 = vld [vmem:[#allocation8 + $0x60] sm:$0xff]  ;;  %v158_v23 = vld [vmem:[#allocation5 + $0x158] sm:$0xff] }
  0x8d   :  { %1831 = vmatprep.subr.bf16.mxu1 %v1830_v47  ;;  %v1834_v57 = vpack.c.bf16 %v288_v53, %v284_v52  ;;  %v148_v59 = vld [vmem:[#allocation5 + $0x108] sm:$0xff]  ;;  %v1836_v62 = vpack.c.bf16 %v287_v61, %v283_v58  ;;  %v147_v6 = vld [vmem:[#allocation5 + $0x100] sm:$0xff]  ;;  %v149_v7 = vld [vmem:[#allocation5 + $0x110] sm:$0xff] }
  0x8e   :  { %1781 = vmatpush1.bf16.msra.mxu0 %v1780_v25  ;;  %1833 = vmatpush1.bf16.msra.mxu1 %v1832_v51  ;;  %v292_v63 = vld [vmem:[#allocation8 + $0x88] sm:$0xff]  ;;  %v291_v3 = vld [vmem:[#allocation8 + $0x80] sm:$0xff]  ;;  %v1798_v5 = vpack.c.bf16 %v150_v60, %v148_v59  ;;  %v1800_v16 = vpack.c.bf16 %v149_v7, %v147_v6  ;;  %v162_v35 = vld [vmem:[#allocation5 + $0x178] sm:$0xff] }
  0x8f   :  { %1783 = vmatprep.subr.bf16.mxu0 %v1782_v26  ;;  %1835 = vmatprep.subr.bf16.mxu1 %v1834_v57  ;;  %v296_v0 = vld [vmem:[#allocation8 + $0xa8] sm:$0xff]  ;;  %v295_v4 = vld [vmem:[#allocation8 + $0xa0] sm:$0xff]  ;;  %v166_v48 = vld [vmem:[#allocation5 + $0x198] sm:$0xff] }
  0x90   :  { %v1838_v2 = vpack.c.bf16 %v296_v0, %v292_v63  ;;  %v300_v8 = vld [vmem:[#allocation8 + $0xc8] sm:$0xff]  ;;  %v1840_v11 = vpack.c.bf16 %v295_v4, %v291_v3  ;;  %v299_v14 = vld [vmem:[#allocation8 + $0xc0] sm:$0xff]  ;;  %v170_v60 = vld [vmem:[#allocation5 + $0x1b8] sm:$0xff] }
  0x91   :  { %v152_v9 = vld [vmem:[#allocation5 + $0x128] sm:$0xff]  ;;  %v151_v20 = vld [vmem:[#allocation5 + $0x120] sm:$0xff]  ;;  %v153_v21 = vld [vmem:[#allocation5 + $0x130] sm:$0xff] }
  0x92   :  { %1785 = vmatpush1.bf16.msra.mxu0 %v1784_v31  ;;  %1837 = vmatpush1.bf16.msra.mxu1 %v1836_v62  ;;  %v304_v12 = vld [vmem:[#allocation8 + $0xe8] sm:$0xff]  ;;  %v303_v15 = vld [vmem:[#allocation8 + $0xe0] sm:$0xff]  ;;  %v1802_v19 = vpack.c.bf16 %v154_v10, %v152_v9  ;;  %v1804_v28 = vpack.c.bf16 %v153_v21, %v151_v20  ;;  %v178_v20 = vld [vmem:[#allocation5 + $0x1f8] sm:$0xff] }
  0x93   :  { %1787 = vmatprep.subr.bf16.mxu0 %v1786_v32  ;;  %1839 = vmatprep.subr.bf16.mxu1 %v1838_v2  ;;  %v1842_v13 = vpack.c.bf16 %v304_v12, %v300_v8  ;;  %v308_v17 = vld [vmem:[#allocation8 + $0x108] sm:$0xff]  ;;  %v1844_v24 = vpack.c.bf16 %v303_v15, %v299_v14  ;;  %v307_v26 = vld [vmem:[#allocation8 + $0x100] sm:$0xff]  ;;  %v174_v8 = vld [vmem:[#allocation5 + $0x1d8] sm:$0xff] }
  0x94   :  { %v312_v18 = vld [vmem:[#allocation8 + $0x128] sm:$0xff]  ;;  %v311_v27 = vld [vmem:[#allocation8 + $0x120] sm:$0xff] }
  0x95   :  { %v156_v22 = vld [vmem:[#allocation5 + $0x148] sm:$0xff]  ;;  %v1846_v25 = vpack.c.bf16 %v312_v18, %v308_v17  ;;  %v155_v32 = vld [vmem:[#allocation5 + $0x140] sm:$0xff]  ;;  %v157_v33 = vld [vmem:[#allocation5 + $0x150] sm:$0xff]  ;;  %v1848_v36 = vpack.c.bf16 %v311_v27, %v307_v26 }
  0x96   :  { %1789 = vmatpush1.bf16.msra.mxu0 %v1788_v37  ;;  %1841 = vmatpush1.bf16.msra.mxu1 %v1840_v11  ;;  %v316_v29 = vld [vmem:[#allocation8 + $0x148] sm:$0xff]  ;;  %v1806_v31 = vpack.c.bf16 %v158_v23, %v156_v22  ;;  %v315_v38 = vld [vmem:[#allocation8 + $0x140] sm:$0xff]  ;;  %v1808_v40 = vpack.c.bf16 %v157_v33, %v155_v32  ;;  %v282_v32 = vld [vmem:[#allocation8 + $0x38] sm:$0xff] }
  0x97   :  { %1791 = vmatprep.subr.bf16.mxu0 %v1790_v39  ;;  %1843 = vmatprep.subr.bf16.mxu1 %v1842_v13  ;;  %v320_v30 = vld [vmem:[#allocation8 + $0x168] sm:$0xff]  ;;  %v319_v39 = vld [vmem:[#allocation8 + $0x160] sm:$0xff] }
  0x98   :  { %v160_v34 = vld [vmem:[#allocation5 + $0x168] sm:$0xff]  ;;  %v1850_v37 = vpack.c.bf16 %v320_v30, %v316_v29  ;;  %v159_v45 = vld [vmem:[#allocation5 + $0x160] sm:$0xff]  ;;  %v161_v46 = vld [vmem:[#allocation5 + $0x170] sm:$0xff]  ;;  %v1852_v49 = vpack.c.bf16 %v319_v39, %v315_v38 }
  0x99   :  { %v324_v42 = vld [vmem:[#allocation8 + $0x188] sm:$0xff]  ;;  %v1810_v44 = vpack.c.bf16 %v162_v35, %v160_v34  ;;  %v323_v51 = vld [vmem:[#allocation8 + $0x180] sm:$0xff]  ;;  %v1812_v53 = vpack.c.bf16 %v161_v46, %v159_v45  ;;  %v290_v45 = vld [vmem:[#allocation8 + $0x78] sm:$0xff] }
  0x9a   :  { %1793 = vmatpush1.bf16.msra.mxu0 %v1792_v50  ;;  %1845 = vmatpush1.bf16.msra.mxu1 %v1844_v24  ;;  %v328_v43 = vld [vmem:[#allocation8 + $0x1a8] sm:$0xff]  ;;  %v327_v52 = vld [vmem:[#allocation8 + $0x1a0] sm:$0xff] }
  0x9b   :  { %1795 = vmatprep.subr.bf16.mxu0 %v1794_v54  ;;  %1847 = vmatprep.subr.bf16.mxu1 %v1846_v25  ;;  %v164_v47 = vld [vmem:[#allocation5 + $0x188] sm:$0xff]  ;;  %v1854_v50 = vpack.c.bf16 %v328_v43, %v324_v42  ;;  %v163_v57 = vld [vmem:[#allocation5 + $0x180] sm:$0xff]  ;;  %v165_v58 = vld [vmem:[#allocation5 + $0x190] sm:$0xff]  ;;  %v1856_v61 = vpack.c.bf16 %v327_v52, %v323_v51 }
  0x9c   :  { %v332_v54 = vld [vmem:[#allocation8 + $0x1c8] sm:$0xff]  ;;  %v1814_v56 = vpack.c.bf16 %v166_v48, %v164_v47  ;;  %v331_v63 = vld [vmem:[#allocation8 + $0x1c0] sm:$0xff]  ;;  %v277_v42 = vld [vmem:[#allocation8 + $0x10] sm:$0xff] }
  0x9d   :  { %v336_v55 = vld [vmem:[#allocation8 + $0x1e8] sm:$0xff]  ;;  %v335_v0 = vld [vmem:[#allocation8 + $0x1e0] sm:$0xff]  ;;  %v281_v43 = vld [vmem:[#allocation8 + $0x30] sm:$0xff] }
  0x9e   :  { %1797 = vmatpush1.bf16.msra.mxu0 %v1796_v1  ;;  %1849 = vmatpush1.bf16.msra.mxu1 %v1848_v36  ;;  %v168_v59 = vld [vmem:[#allocation5 + $0x1a8] sm:$0xff]  ;;  %v1858_v62 = vpack.c.bf16 %v336_v55, %v332_v54  ;;  %v1816_v1 = vpack.c.bf16 %v165_v58, %v163_v57  ;;  %v169_v6 = vld [vmem:[#allocation5 + $0x1b0] sm:$0xff]  ;;  %v1860_v9 = vpack.c.bf16 %v335_v0, %v331_v63  ;;  %v171_v17 = vld [vmem:[#allocation5 + $0x1c0] sm:$0xff] }
  0x9f   :  { %1799 = vmatprep.subr.bf16.mxu0 %v1798_v5  ;;  %1851 = vmatprep.subr.bf16.mxu1 %v1850_v37  ;;  %v340_v2 = vld [vmem:[#allocation8 + $0x208] sm:$0xff]  ;;  %v1818_v4 = vpack.c.bf16 %v170_v60, %v168_v59  ;;  %v167_v5 = vld [vmem:[#allocation5 + $0x1a0] sm:$0xff]  ;;  %v285_v54 = vld [vmem:[#allocation8 + $0x50] sm:$0xff] }
  0xa0   :  { %v344_v3 = vld [vmem:[#allocation8 + $0x228] sm:$0xff]  ;;  %v339_v11 = vld [vmem:[#allocation8 + $0x200] sm:$0xff]  ;;  %v1820_v13 = vpack.c.bf16 %v169_v6, %v167_v5  ;;  %v289_v55 = vld [vmem:[#allocation8 + $0x70] sm:$0xff] }
  0xa1   :  { %v172_v7 = vld [vmem:[#allocation5 + $0x1c8] sm:$0xff]  ;;  %v1862_v10 = vpack.c.bf16 %v344_v3, %v340_v2  ;;  %v173_v18 = vld [vmem:[#allocation5 + $0x1d0] sm:$0xff]  ;;  %v175_v29 = vld [vmem:[#allocation5 + $0x1e0] sm:$0xff] }
  0xa2   :  { %1801 = vmatpush1.bf16.msra.mxu0 %v1800_v16  ;;  %1853 = vmatpush1.bf16.msra.mxu1 %v1852_v49  ;;  %v343_v12 = vld [vmem:[#allocation8 + $0x220] sm:$0xff]  ;;  %v348_v14 = vld [vmem:[#allocation8 + $0x248] sm:$0xff]  ;;  %v1822_v16 = vpack.c.bf16 %v174_v8, %v172_v7  ;;  %v1824_v25 = vpack.c.bf16 %v173_v18, %v171_v17  ;;  %v298_v57 = vld [vmem:[#allocation8 + $0xb8] sm:$0xff] }
  0xa3   :  { %1803 = vmatprep.subr.bf16.mxu0 %v1802_v19  ;;  %1855 = vmatprep.subr.bf16.mxu1 %v1854_v50  ;;  %v352_v15 = vld [vmem:[#allocation8 + $0x268] sm:$0xff]  ;;  %v1864_v21 = vpack.c.bf16 %v343_v12, %v339_v11  ;;  %v347_v23 = vld [vmem:[#allocation8 + $0x240] sm:$0xff]  ;;  %v1896_v50 = vpack.c.bf16 %v281_v43, %v277_v42  ;;  %v293_v2 = vld [vmem:[#allocation8 + $0x90] sm:$0xff] }
  0xa4   :  { %v176_v19 = vld [vmem:[#allocation5 + $0x1e8] sm:$0xff]  ;;  %v1866_v22 = vpack.c.bf16 %v352_v15, %v348_v14  ;;  %v177_v30 = vld [vmem:[#allocation5 + $0x1f0] sm:$0xff]  ;;  %v306_v5 = vld [vmem:[#allocation8 + $0xf8] sm:$0xff] }
  0xa5   :  { %v351_v24 = vld [vmem:[#allocation8 + $0x260] sm:$0xff]  ;;  %v356_v26 = vld [vmem:[#allocation8 + $0x288] sm:$0xff]  ;;  %v1828_v37 = vpack.c.bf16 %v177_v30, %v175_v29  ;;  %v297_v3 = vld [vmem:[#allocation8 + $0xb0] sm:$0xff] }
  0xa6   :  { %1805 = vmatpush1.bf16.msra.mxu0 %v1804_v28  ;;  %1857 = vmatpush1.bf16.msra.mxu1 %v1856_v61  ;;  %v360_v27 = vld [vmem:[#allocation8 + $0x2a8] sm:$0xff]  ;;  %v1826_v28 = vpack.c.bf16 %v178_v20, %v176_v19  ;;  %v1868_v33 = vpack.c.bf16 %v351_v24, %v347_v23  ;;  %v355_v35 = vld [vmem:[#allocation8 + $0x280] sm:$0xff]  ;;  %v305_v14 = vld [vmem:[#allocation8 + $0xf0] sm:$0xff] }
  0xa7   :  { %1807 = vmatprep.subr.bf16.mxu0 %v1806_v31  ;;  %1859 = vmatprep.subr.bf16.mxu1 %v1858_v62  ;;  %v278_v31 = vld [vmem:[#allocation8 + $0x18] sm:$0xff]  ;;  %v1870_v34 = vpack.c.bf16 %v360_v27, %v356_v26  ;;  %v359_v36 = vld [vmem:[#allocation8 + $0x2a0] sm:$0xff]  ;;  %v364_v38 = vld [vmem:[#allocation8 + $0x2c8] sm:$0xff]  ;;  %v1900_v62 = vpack.c.bf16 %v289_v55, %v285_v54 }
  0xa8   :  { %v368_v39 = vld [vmem:[#allocation8 + $0x2e8] sm:$0xff]  ;;  %v1872_v46 = vpack.c.bf16 %v359_v36, %v355_v35  ;;  %v363_v48 = vld [vmem:[#allocation8 + $0x2c0] sm:$0xff]  ;;  %v310_v15 = vld [vmem:[#allocation8 + $0x118] sm:$0xff] }
  0xa9   :  { %v1874_v47 = vpack.c.bf16 %v368_v39, %v364_v38  ;;  %v367_v49 = vld [vmem:[#allocation8 + $0x2e0] sm:$0xff]  ;;  %v372_v51 = vld [vmem:[#allocation8 + $0x308] sm:$0xff]  ;;  %v318_v23 = vld [vmem:[#allocation8 + $0x158] sm:$0xff] }
  0xaa   :  { %1809 = vmatpush1.bf16.msra.mxu0 %v1808_v40  ;;  %1861 = vmatpush1.bf16.msra.mxu1 %v1860_v9  ;;  %v1894_v40 = vpack.c.bf16 %v282_v32, %v278_v31  ;;  %v376_v52 = vld [vmem:[#allocation8 + $0x328] sm:$0xff]  ;;  %v1876_v58 = vpack.c.bf16 %v367_v49, %v363_v48  ;;  %v371_v60 = vld [vmem:[#allocation8 + $0x300] sm:$0xff]  ;;  %v1904_v9 = vpack.c.bf16 %v297_v3, %v293_v2  ;;  %v322_v24 = vld [vmem:[#allocation8 + $0x178] sm:$0xff] }
  0xab   :  { %1811 = vmatprep.subr.bf16.mxu0 %v1810_v44  ;;  %1863 = vmatprep.subr.bf16.mxu1 %v1862_v10  ;;  %v286_v44 = vld [vmem:[#allocation8 + $0x58] sm:$0xff]  ;;  %v1878_v59 = vpack.c.bf16 %v376_v52, %v372_v51  ;;  %v375_v61 = vld [vmem:[#allocation8 + $0x320] sm:$0xff]  ;;  %v380_v63 = vld [vmem:[#allocation8 + $0x348] sm:$0xff]  ;;  %v1914_v26 = vpack.c.bf16 %v322_v24, %v318_v23 }
  0xac   :  { %v384_v0 = vld [vmem:[#allocation8 + $0x368] sm:$0xff]  ;;  %v1880_v6 = vpack.c.bf16 %v375_v61, %v371_v60  ;;  %v379_v8 = vld [vmem:[#allocation8 + $0x340] sm:$0xff]  ;;  %v317_v27 = vld [vmem:[#allocation8 + $0x150] sm:$0xff] }
  0xad   :  { %v1882_v7 = vpack.c.bf16 %v384_v0, %v380_v63  ;;  %v388_v10 = vld [vmem:[#allocation8 + $0x388] sm:$0xff]  ;;  %v326_v29 = vld [vmem:[#allocation8 + $0x198] sm:$0xff]  ;;  %v333_v39 = vld [vmem:[#allocation8 + $0x1d0] sm:$0xff] }
  0xae   :  { %1813 = vmatpush1.bf16.msra.mxu0 %v1812_v53  ;;  %1865 = vmatpush1.bf16.msra.mxu1 %v1864_v21  ;;  %v1898_v53 = vpack.c.bf16 %v290_v45, %v286_v44  ;;  %v392_v11 = vld [vmem:[#allocation8 + $0x3a8] sm:$0xff]  ;;  %v309_v21 = vld [vmem:[#allocation8 + $0x110] sm:$0xff]  ;;  %v330_v30 = vld [vmem:[#allocation8 + $0x1b8] sm:$0xff] }
  0xaf   :  { %1815 = vmatprep.subr.bf16.mxu0 %v1814_v56  ;;  %1867 = vmatprep.subr.bf16.mxu1 %v1866_v22  ;;  %v294_v56 = vld [vmem:[#allocation8 + $0x98] sm:$0xff]  ;;  %v1886_v18 = vpack.c.bf16 %v392_v11, %v388_v10  ;;  %v313_v22 = vld [vmem:[#allocation8 + $0x130] sm:$0xff]  ;;  %v1918_v32 = vpack.c.bf16 %v330_v30, %v326_v29  ;;  %v396_v23 = vld [vmem:[#allocation8 + $0x3c8] sm:$0xff] }
  0xb0   :  { %v334_v35 = vld [vmem:[#allocation8 + $0x1d8] sm:$0xff]  ;;  %v349_v52 = vld [vmem:[#allocation8 + $0x250] sm:$0xff]  ;;  %v400_v24 = vld [vmem:[#allocation8 + $0x3e8] sm:$0xff] }
  0xb1   :  { %v338_v36 = vld [vmem:[#allocation8 + $0x1f8] sm:$0xff]  ;;  %v365_v0 = vld [vmem:[#allocation8 + $0x2d0] sm:$0xff]  ;;  %v399_v29 = vld [vmem:[#allocation8 + $0x3e0] sm:$0xff] }
  0xb2   :  { %1817 = vmatpush1.bf16.msra.mxu0 %v1816_v1  ;;  %1869 = vmatpush1.bf16.msra.mxu1 %v1868_v33  ;;  %v1902_v1 = vpack.c.bf16 %v298_v57, %v294_v56  ;;  %v325_v33 = vld [vmem:[#allocation8 + $0x190] sm:$0xff]  ;;  %v1922_v38 = vpack.c.bf16 %v338_v36, %v334_v35  ;;  %v342_v42 = vld [vmem:[#allocation8 + $0x218] sm:$0xff] }
  0xb3   :  { %1819 = vmatprep.subr.bf16.mxu0 %v1818_v4  ;;  %1871 = vmatprep.subr.bf16.mxu1 %v1870_v34  ;;  %v302_v4 = vld [vmem:[#allocation8 + $0xd8] sm:$0xff]  ;;  %v329_v34 = vld [vmem:[#allocation8 + $0x1b0] sm:$0xff] }
  0xb4   :  { %v1906_v12 = vpack.c.bf16 %v306_v5, %v302_v4  ;;  %v346_v43 = vld [vmem:[#allocation8 + $0x238] sm:$0xff]  ;;  %v381_v11 = vld [vmem:[#allocation8 + $0x350] sm:$0xff] }
  0xb5   :  { %v1926_v45 = vpack.c.bf16 %v346_v43, %v342_v42  ;;  %v350_v48 = vld [vmem:[#allocation8 + $0x258] sm:$0xff]  ;;  %v572_v35 = vld [vmem:[#allocation11 + $0x8] sm:$0xff]  ;;  %v181_v42 = vlaneseq }
  0xb6   :  { %1821 = vmatpush1.bf16.msra.mxu0 %v1820_v13  ;;  %1873 = vmatpush1.bf16.msra.mxu1 %v1872_v46  ;;  %v301_v13 = vld [vmem:[#allocation8 + $0xd0] sm:$0xff]  ;;  %v354_v49 = vld [vmem:[#allocation8 + $0x278] sm:$0xff] }
  0xb7   :  { %1823 = vmatprep.subr.bf16.mxu0 %v1822_v16  ;;  %1875 = vmatprep.subr.bf16.mxu1 %v1874_v47  ;;  %v314_v16 = vld [vmem:[#allocation8 + $0x138] sm:$0xff]  ;;  %v1908_v19 = vpack.c.bf16 %v305_v14, %v301_v13  ;;  %v341_v46 = vld [vmem:[#allocation8 + $0x210] sm:$0xff]  ;;  %v1930_v51 = vpack.c.bf16 %v354_v49, %v350_v48  ;;  %v2831_v43 = vshrl.u32 %v181_v42, 7 }
  0xb8   :  { %v1910_v20 = vpack.c.bf16 %v314_v16, %v310_v15  ;;  %v345_v47 = vld [vmem:[#allocation8 + $0x230] sm:$0xff]  ;;  %v358_v54 = vld [vmem:[#allocation8 + $0x298] sm:$0xff] }
  0xb9   :  { %v362_v55 = vld [vmem:[#allocation8 + $0x2b8] sm:$0xff]  ;;  %v580_v36 = vld [vmem:[#allocation11 + $0x48] sm:$0xff] }
  0xba   :  { %1825 = vmatpush1.bf16.msra.mxu0 %v1824_v25  ;;  %1877 = vmatpush1.bf16.msra.mxu1 %v1876_v58  ;;  %v1912_v25 = vpack.c.bf16 %v313_v22, %v309_v21  ;;  %v1934_v57 = vpack.c.bf16 %v362_v55, %v358_v54  ;;  %v357_v58 = vld [vmem:[#allocation8 + $0x290] sm:$0xff]  ;;  %v366_v60 = vld [vmem:[#allocation8 + $0x2d8] sm:$0xff] }
  0xbb   :  { %1827 = vmatprep.subr.bf16.mxu0 %v1826_v28  ;;  %1879 = vmatprep.subr.bf16.mxu1 %v1878_v59  ;;  %v321_v28 = vld [vmem:[#allocation8 + $0x170] sm:$0xff]  ;;  %v370_v61 = vld [vmem:[#allocation8 + $0x2f8] sm:$0xff] }
  0xbc   :  { %v1916_v31 = vpack.c.bf16 %v321_v28, %v317_v27  ;;  %v361_v59 = vld [vmem:[#allocation8 + $0x2b0] sm:$0xff]  ;;  %v1938_v63 = vpack.c.bf16 %v370_v61, %v366_v60  ;;  %v374_v2 = vld [vmem:[#allocation8 + $0x318] sm:$0xff]  ;;  %v395_v28 = vld [vmem:[#allocation8 + $0x3c0] sm:$0xff] }
  0xbd   :  { %v378_v3 = vld [vmem:[#allocation8 + $0x338] sm:$0xff]  ;;  %v393_v21 = vld [vmem:[#allocation8 + $0x3b0] sm:$0xff] }
  0xbe   :  { %1829 = vmatpush1.bf16.msra.mxu0 %v1828_v37  ;;  %1881 = vmatpush1.bf16.msra.mxu1 %v1880_v6  ;;  %v1920_v37 = vpack.c.bf16 %v329_v34, %v325_v33  ;;  %v1942_v5 = vpack.c.bf16 %v378_v3, %v374_v2  ;;  %v373_v6 = vld [vmem:[#allocation8 + $0x310] sm:$0xff]  ;;  %v390_v13 = vld [vmem:[#allocation8 + $0x398] sm:$0xff] }
  0xbf   :  { %1895 = vmatprep.subr.bf16.mxu0 %v1894_v40  ;;  %1883 = vmatprep.subr.bf16.mxu1 %v1882_v7  ;;  %v337_v40 = vld [vmem:[#allocation8 + $0x1f0] sm:$0xff]  ;;  %v394_v14 = vld [vmem:[#allocation8 + $0x3b8] sm:$0xff] }
  0xc0   :  { %v1924_v44 = vpack.c.bf16 %v337_v40, %v333_v39  ;;  %v377_v7 = vld [vmem:[#allocation8 + $0x330] sm:$0xff]  ;;  %v1950_v16 = vpack.c.bf16 %v394_v14, %v390_v13  ;;  %v402_v27 = vld [vmem:[#allocation8 + $0x3f8] sm:$0xff]  ;;  %v611_v13 = vld [vmem:[#allocation11 + $0x140] sm:$0xff] }
  0xc1   :  { %267 = vmatmul.mubr.f32.vlgmr.msra.gmra.mrb[0].mxu0 %v2826_v41  ;;  %v383_v41 = vld [vmem:[#allocation8 + $0x360] sm:$0xff]  ;;  %v401_v33 = vld [vmem:[#allocation8 + $0x3f0] sm:$0xff] }
  0xc2   :  { %1897 = vmatpush1.bf16.msra.mxu0 %v1896_v50  ;;  %v1884_v17 = vpack.c.bf16 %v383_v41, %v379_v8  ;;  %v1928_v50 = vpack.c.bf16 %v345_v47, %v341_v46  ;;  %v382_v8 = vld [vmem:[#allocation8 + $0x358] sm:$0xff]  ;;  %v2837_v46 = vsub.s32 1, %v2831_v43 }
  0xc3   :  { %1899 = vmatprep.subr.bf16.mxu0 %v1898_v53  ;;  %v353_v53 = vld [vmem:[#allocation8 + $0x270] sm:$0xff]  ;;  %v386_v41 = vld [vmem:[#allocation8 + $0x378] sm:$0xff] }
  0xc4   :  { %1885 = vmatpush1.bf16.msra.mxu1 %v1884_v17  ;;  %v1932_v56 = vpack.c.bf16 %v353_v53, %v349_v52  ;;  %v1946_v10 = vpack.c.bf16 %v386_v41, %v382_v8  ;;  %v387_v17 = vld [vmem:[#allocation8 + $0x380] sm:$0xff]  ;;  %v573_v54 = vld [vmem:[#allocation11 + $0x10] sm:$0xff]  ;;  %v612_v8 = vld [vmem:[#allocation11 + $0x148] sm:$0xff] }
  0xc5   :  { %1887 = vmatprep.subr.bf16.mxu1 %v1886_v18  ;;  %v391_v18 = vld [vmem:[#allocation8 + $0x3a0] sm:$0xff]  ;;  %v581_v55 = vld [vmem:[#allocation11 + $0x50] sm:$0xff] }
  0xc6   :  { %1901 = vmatpush1.bf16.msra.mxu0 %v1900_v62  ;;  %v1936_v62 = vpack.c.bf16 %v361_v59, %v357_v58  ;;  %v582_v39 = vld [vmem:[#allocation11 + $0x58] sm:$0xff]  ;;  %v596_v58 = vld [vmem:[#allocation11 + $0xc8] sm:$0xff]  ;;  %v645_v42 = vld [vmem:[#allocation11 + $0x250] sm:$0xff] }
  0xc7   :  { %1903 = vmatprep.subr.bf16.mxu0 %v1902_v1  ;;  %v369_v1 = vld [vmem:[#allocation8 + $0x2f0] sm:$0xff]  ;;  %v590_v59 = vld [vmem:[#allocation11 + $0x98] sm:$0xff] }
  0xc8   :  { %v1940_v4 = vpack.c.bf16 %v369_v1, %v365_v0  ;;  %v598_v60 = vld [vmem:[#allocation11 + $0xd8] sm:$0xff]  ;;  %v587_v0 = vld [vmem:[#allocation11 + $0x80] sm:$0xff] }
  0xc9   :  { %v595_v1 = vld [vmem:[#allocation11 + $0xc0] sm:$0xff]  ;;  %v606_v41 = vld [vmem:[#allocation11 + $0x118] sm:$0xff] }
  0xca   :  { %1905 = vmatpush1.bf16.msra.mxu0 %v1904_v9  ;;  %v1944_v9 = vpack.c.bf16 %v377_v7, %v373_v6  ;;  %v597_v6 = vld [vmem:[#allocation11 + $0xd0] sm:$0xff]  ;;  %v604_v7 = vld [vmem:[#allocation11 + $0x108] sm:$0xff] }
  0xcb   :  { %1907 = vmatprep.subr.bf16.mxu0 %v1906_v12  ;;  %v385_v12 = vld [vmem:[#allocation8 + $0x370] sm:$0xff]  ;;  %v1966_v14 = vpack.c.bf16 %v612_v8, %v604_v7  ;;  %v686_v8 = vld [vmem:[#allocation11 + $0x398] sm:$0xff] }
  0xcc   :  { %v1948_v15 = vpack.c.bf16 %v385_v12, %v381_v11  ;;  %v603_v12 = vld [vmem:[#allocation11 + $0x100] sm:$0xff]  ;;  %v692_v7 = vld [vmem:[#allocation11 + $0x3c8] sm:$0xff] }
  0xce   :  { %1909 = vmatpush1.bf16.msra.mxu0 %v1908_v19  ;;  %v389_v19 = vld [vmem:[#allocation8 + $0x390] sm:$0xff] }
  0xcf   :  { %1911 = vmatprep.subr.bf16.mxu0 %v1910_v20  ;;  %v1888_v20 = vpack.c.bf16 %v391_v18, %v387_v17  ;;  %v1952_v22 = vpack.c.bf16 %v393_v21, %v389_v19  ;;  %v613_v17 = vld [vmem:[#allocation11 + $0x150] sm:$0xff]  ;;  %v620_v18 = vld [vmem:[#allocation11 + $0x188] sm:$0xff]  ;;  %v630_v21 = vld [vmem:[#allocation11 + $0x1d8] sm:$0xff] }
  0xd0   :  { %v628_v19 = vld [vmem:[#allocation11 + $0x1c8] sm:$0xff] }
  0xd1   :  { %1889 = vmatpush1.bf16.msra.mxu1 %v1888_v20  ;;  %v622_v20 = vld [vmem:[#allocation11 + $0x198] sm:$0xff] }
  0xd2   :  { %1913 = vmatpush1.bf16.msra.mxu0 %v1912_v25  ;;  %v398_v25 = vld [vmem:[#allocation8 + $0x3d8] sm:$0xff] }
  0xd3   :  { %1915 = vmatprep.subr.bf16.mxu0 %v1914_v26  ;;  %v1890_v26 = vpack.c.bf16 %v400_v24, %v396_v23  ;;  %v1954_v30 = vpack.c.bf16 %v402_v27, %v398_v25  ;;  %v619_v24 = vld [vmem:[#allocation11 + $0x180] sm:$0xff]  ;;  %v2098_v27 = vpack.c.bf16 %v630_v21, %v622_v20  ;;  %v710_v20 = vld [vmem:[#allocation11 + $0x458] sm:$0xff] }
  0xd4   :  { %v627_v25 = vld [vmem:[#allocation11 + $0x1c0] sm:$0xff] }
  0xd5   :  { %1891 = vmatprep.subr.bf16.mxu1 %v1890_v26  ;;  %v1970_v26 = vpack.c.bf16 %v628_v19, %v620_v18  ;;  %v708_v18 = vld [vmem:[#allocation11 + $0x448] sm:$0xff]  ;;  %v702_v19 = vld [vmem:[#allocation11 + $0x418] sm:$0xff] }
  0xd6   :  { %1917 = vmatpush1.bf16.msra.mxu0 %v1916_v31  ;;  %v1892_v31 = vpack.c.bf16 %v399_v29, %v395_v28  ;;  %v621_v28 = vld [vmem:[#allocation11 + $0x190] sm:$0xff] }
  0xd7   :  { %1919 = vmatprep.subr.bf16.mxu0 %v1918_v32  ;;  %v397_v32 = vld [vmem:[#allocation8 + $0x3d0] sm:$0xff] }
  0xd8   :  { %v1956_v34 = vpack.c.bf16 %v401_v33, %v397_v32  ;;  %1893 = vmatpush1.bf16.msra.mxu1 %v1892_v31  ;;  %v629_v29 = vld [vmem:[#allocation11 + $0x1d0] sm:$0xff]  ;;  %v644_v31 = vld [vmem:[#allocation11 + $0x248] sm:$0xff]  ;;  %v638_v32 = vld [vmem:[#allocation11 + $0x218] sm:$0xff] }
  0xd9   :  { %v646_v33 = vld [vmem:[#allocation11 + $0x258] sm:$0xff] }
  0xda   :  { %1921 = vmatpush1.bf16.msra.mxu0 %v1920_v37  ;;  %v574_v37 = vld [vmem:[#allocation11 + $0x18] sm:$0xff] }
  0xdb   :  { %1923 = vmatprep.subr.bf16.mxu0 %v1922_v38  ;;  %v1958_v38 = vpack.c.bf16 %v580_v36, %v572_v35  ;;  %v2086_v40 = vpack.c.bf16 %v582_v39, %v574_v37  ;;  %v2100_v35 = vpack.c.bf16 %v629_v29, %v621_v28  ;;  %v635_v36 = vld [vmem:[#allocation11 + $0x200] sm:$0xff]  ;;  %v2102_v39 = vpack.c.bf16 %v646_v33, %v638_v32  ;;  %v709_v28 = vld [vmem:[#allocation11 + $0x450] sm:$0xff]  ;;  %v716_v29 = vld [vmem:[#allocation11 + $0x488] sm:$0xff] }
  0xdc   :  { %v643_v37 = vld [vmem:[#allocation11 + $0x240] sm:$0xff]  ;;  %v726_v32 = vld [vmem:[#allocation11 + $0x4d8] sm:$0xff] }
  0xdd   :  { %1959 = vmatprep.subr.bf16.mxu1 %v1958_v38 }
  0xde   :  { %1925 = vmatpush1.bf16.msra.mxu0 %v1924_v44  ;;  %v2834_v44 = vsub.s32 0, %v2831_v43 }
  0xdf   :  { %1927 = vmatprep.subr.bf16.mxu0 %v1926_v45  ;;  %v179_v45 = vld [vmem:[#allocation7] sm:$0x3] }
  0xe0   :  { %v184_v47 = vrot.slane %v179_v45, %v2834_v44  ;;  %v188_v48 = vrot.slane %v179_v45, %v2837_v46  ;;  %v652_v45 = vld [vmem:[#allocation11 + $0x288] sm:$0xff] }
  0xe2   :  { %1929 = vmatpush1.bf16.msra.mxu0 %v1928_v50  ;;  %v571_v50 = vld [vmem:[#allocation11] sm:$0xff] }
  0xe3   :  { %1931 = vmatprep.subr.bf16.mxu0 %v1930_v51  ;;  %v579_v51 = vld [vmem:[#allocation11 + $0x40] sm:$0xff] }
  0xe6   :  { %1933 = vmatpush1.bf16.msra.mxu0 %v1932_v56  ;;  %v588_v56 = vld [vmem:[#allocation11 + $0x88] sm:$0xff] }
  0xe7   :  { %1935 = vmatprep.subr.bf16.mxu0 %v1934_v57  ;;  %v1962_v3 = vpack.c.bf16 %v596_v58, %v588_v56  ;;  %v653_v56 = vld [vmem:[#allocation11 + $0x290] sm:$0xff]  ;;  %v668_v58 = vld [vmem:[#allocation11 + $0x308] sm:$0xff] }
  0xea   :  { %1937 = vmatpush1.bf16.msra.mxu0 %v1936_v62  ;;  %v1960_v62 = vpack.c.bf16 %v579_v51, %v571_v50  ;;  %v1976_v50 = vpack.c.bf16 %v643_v37, %v635_v36  ;;  %v723_v36 = vld [vmem:[#allocation11 + $0x4c0] sm:$0xff] }
  0xeb   :  { %1939 = vmatprep.subr.bf16.mxu0 %v1938_v63  ;;  %v2088_v63 = vpack.c.bf16 %v581_v55, %v573_v54 }
  0xee   :  { %1941 = vmatpush1.bf16.msra.mxu0 %v1940_v4  ;;  %v2090_v4 = vpack.c.bf16 %v598_v60, %v590_v59  ;;  %v676_v59 = vld [vmem:[#allocation11 + $0x348] sm:$0xff]  ;;  %v670_v60 = vld [vmem:[#allocation11 + $0x318] sm:$0xff] }
  0xef   :  { %1943 = vmatprep.subr.bf16.mxu0 %v1942_v5  ;;  %v589_v5 = vld [vmem:[#allocation11 + $0x90] sm:$0xff] }
  0xf0   :  { %v2092_v11 = vpack.c.bf16 %v597_v6, %v589_v5  ;;  %v677_v5 = vld [vmem:[#allocation11 + $0x350] sm:$0xff]  ;;  %v684_v6 = vld [vmem:[#allocation11 + $0x388] sm:$0xff] }
  0xf2   :  { %1945 = vmatpush1.bf16.msra.mxu0 %v1944_v9  ;;  %v614_v9 = vld [vmem:[#allocation11 + $0x158] sm:$0xff] }
  0xf3   :  { %1947 = vmatprep.subr.bf16.mxu0 %v1946_v10  ;;  %v1964_v10 = vpack.c.bf16 %v595_v1, %v587_v0  ;;  %v667_v0 = vld [vmem:[#allocation11 + $0x300] sm:$0xff] }
  0xf4   :  { %v675_v1 = vld [vmem:[#allocation11 + $0x340] sm:$0xff] }
  0xf6   :  { %1949 = vmatpush1.bf16.msra.mxu0 %v1948_v15  ;;  %v2094_v15 = vpack.c.bf16 %v614_v9, %v606_v41  ;;  %v694_v41 = vld [vmem:[#allocation11 + $0x3d8] sm:$0xff]  ;;  %v1984_v9 = vpack.c.bf16 %v675_v1, %v667_v0  ;;  %v755_v0 = vld [vmem:[#allocation11 + $0x5c0] sm:$0xff] }
  0xf7   :  { %1951 = vmatprep.subr.bf16.mxu0 %v1950_v16  ;;  %v605_v16 = vld [vmem:[#allocation11 + $0x110] sm:$0xff] }
  0xf8   :  { %v2096_v23 = vpack.c.bf16 %v613_v17, %v605_v16  ;;  %v693_v16 = vld [vmem:[#allocation11 + $0x3d0] sm:$0xff]  ;;  %v700_v17 = vld [vmem:[#allocation11 + $0x408] sm:$0xff] }
  0xfa   :  { %1953 = vmatpush1.bf16.msra.mxu0 %v1952_v22  ;;  %v1968_v22 = vpack.c.bf16 %v611_v13, %v603_v12  ;;  %v691_v12 = vld [vmem:[#allocation11 + $0x3c0] sm:$0xff]  ;;  %v1986_v13 = vpack.c.bf16 %v692_v7, %v684_v6  ;;  %v772_v6 = vld [vmem:[#allocation11 + $0x648] sm:$0xff]  ;;  %v766_v7 = vld [vmem:[#allocation11 + $0x618] sm:$0xff] }
  0xfb   :  { %1955 = vmatprep.subr.bf16.mxu0 %v1954_v30  ;;  %v636_v30 = vld [vmem:[#allocation11 + $0x208] sm:$0xff] }
  0xfc   :  { %v1974_v38 = vpack.c.bf16 %v644_v31, %v636_v30  ;;  %v724_v30 = vld [vmem:[#allocation11 + $0x4c8] sm:$0xff]  ;;  %v718_v31 = vld [vmem:[#allocation11 + $0x498] sm:$0xff] }
  0xfd   :  { %v1994_v37 = vpack.c.bf16 %v724_v30, %v716_v29  ;;  %v804_v29 = vld [vmem:[#allocation11 + $0x748] sm:$0xff]  ;;  %v798_v30 = vld [vmem:[#allocation11 + $0x718] sm:$0xff] }
  0xfe   :  { %1957 = vmatpush1.bf16.msra.mxu0 %v1956_v34  ;;  %v1972_v34 = vpack.c.bf16 %v627_v25, %v619_v24  ;;  %v707_v24 = vld [vmem:[#allocation11 + $0x440] sm:$0xff]  ;;  %v1990_v25 = vpack.c.bf16 %v708_v18, %v700_v17  ;;  %v788_v17 = vld [vmem:[#allocation11 + $0x6c8] sm:$0xff]  ;;  %v782_v18 = vld [vmem:[#allocation11 + $0x698] sm:$0xff] }
  0xff   :  { %2087 = vmatprep.subr.bf16.mxu0 %v2086_v40  ;;  %v637_v40 = vld [vmem:[#allocation11 + $0x210] sm:$0xff] }
 0x100   :  { %v2104_v51 = vpack.c.bf16 %v645_v42, %v637_v40  ;;  %v725_v40 = vld [vmem:[#allocation11 + $0x4d0] sm:$0xff]  ;;  %v732_v42 = vld [vmem:[#allocation11 + $0x508] sm:$0xff] }
 0x194   :  { %v268_v49 = vpop.f32.mrb[0].mxu0 }
 0x195   :  { %v269_v52 = vadd.f32 %v268_v49, %v184_v47  ;;  %v270_v53 = vpop.f32.mrb[1].mxu0  ;;  %v660_v47 = vld [vmem:[#allocation11 + $0x2c8] sm:$0xff]  ;;  %v662_v49 = vld [vmem:[#allocation11 + $0x2d8] sm:$0xff] }
 0x196   :  { %v271_v57 = vadd.f32 %v270_v53, %v188_v48  ;;  %v654_v48 = vld [vmem:[#allocation11 + $0x298] sm:$0xff]  ;;  %v659_v53 = vld [vmem:[#allocation11 + $0x2c0] sm:$0xff]  ;;  %v1978_v54 = vpack.c.bf16 %v660_v47, %v652_v45  ;;  %v740_v45 = vld [vmem:[#allocation11 + $0x548] sm:$0xff] }
 0x197   :  { %v273_v2 = vmax.f32 %v269_v52, 0.0  ;;  %v651_v52 = vld [vmem:[#allocation11 + $0x280] sm:$0xff]  ;;  %v2106_v55 = vpack.c.bf16 %v662_v49, %v654_v48  ;;  %v734_v47 = vld [vmem:[#allocation11 + $0x518] sm:$0xff] }
 0x198   :  { %v274_v61 = vmax.f32 %v271_v57, 0.0  ;;  %v661_v57 = vld [vmem:[#allocation11 + $0x2d0] sm:$0xff]  ;;  %v742_v48 = vld [vmem:[#allocation11 + $0x558] sm:$0xff] }
 0x19a   :  { %489 = vmatprep.mubr.f32.mxu1 %v274_v61  ;;  %560 = vmatprep.mubr.f32.mxu0 %v274_v61  ;;  %v678_v61 = vld [vmem:[#allocation11 + $0x358] sm:$0xff] }
 0x19b   :  { %490 = vmatmul.mubr.f32.vlgmr.msra.gmra.mrb[0].mxu1 %v273_v2  ;;  %561 = vmatmul.mubr.f32.vlgmr.msra.gmra.mrb[2].mxu0 %v273_v2  ;;  %v1982_v2 = vpack.c.bf16 %v676_v59, %v668_v58  ;;  %v756_v58 = vld [vmem:[#allocation11 + $0x5c8] sm:$0xff]  ;;  %v750_v59 = vld [vmem:[#allocation11 + $0x598] sm:$0xff] }
 0x19c   :  { %1961 = vmatpush1.bf16.msra.mxu1 %v1960_v62  ;;  %2089 = vmatpush1.bf16.msra.mxu0 %v2088_v63  ;;  %v1980_v62 = vpack.c.bf16 %v659_v53, %v651_v52  ;;  %v2108_v63 = vpack.c.bf16 %v661_v57, %v653_v56  ;;  %v739_v52 = vld [vmem:[#allocation11 + $0x540] sm:$0xff]  ;;  %v1998_v53 = vpack.c.bf16 %v740_v45, %v732_v42  ;;  %v741_v56 = vld [vmem:[#allocation11 + $0x550] sm:$0xff]  ;;  %v748_v57 = vld [vmem:[#allocation11 + $0x588] sm:$0xff] }
 0x19d   :  { %1963 = vmatprep.subr.bf16.mxu1 %v1962_v3  ;;  %2091 = vmatprep.subr.bf16.mxu0 %v2090_v4  ;;  %v2110_v3 = vpack.c.bf16 %v678_v61, %v670_v60  ;;  %v669_v4 = vld [vmem:[#allocation11 + $0x310] sm:$0xff]  ;;  %v758_v60 = vld [vmem:[#allocation11 + $0x5d8] sm:$0xff]  ;;  %v2002_v1 = vpack.c.bf16 %v756_v58, %v748_v57  ;;  %v812_v45 = vld [vmem:[#allocation11 + $0x788] sm:$0xff] }
 0x19e   :  { %v828_v58 = vld [vmem:[#allocation11 + $0x808] sm:$0xff] }
 0x1a0   :  { %1965 = vmatpush1.bf16.msra.mxu1 %v1964_v10  ;;  %2093 = vmatpush1.bf16.msra.mxu0 %v2092_v11  ;;  %v2112_v10 = vpack.c.bf16 %v677_v5, %v669_v4  ;;  %v683_v11 = vld [vmem:[#allocation11 + $0x380] sm:$0xff]  ;;  %v757_v4 = vld [vmem:[#allocation11 + $0x5d0] sm:$0xff]  ;;  %v764_v5 = vld [vmem:[#allocation11 + $0x608] sm:$0xff] }
 0x1a1   :  { %1967 = vmatprep.subr.bf16.mxu1 %v1966_v14  ;;  %2095 = vmatprep.subr.bf16.mxu0 %v2094_v15  ;;  %v2114_v14 = vpack.c.bf16 %v694_v41, %v686_v8  ;;  %v685_v15 = vld [vmem:[#allocation11 + $0x390] sm:$0xff]  ;;  %v1988_v21 = vpack.c.bf16 %v691_v12, %v683_v11  ;;  %v774_v8 = vld [vmem:[#allocation11 + $0x658] sm:$0xff]  ;;  %v771_v11 = vld [vmem:[#allocation11 + $0x640] sm:$0xff]  ;;  %v2006_v12 = vpack.c.bf16 %v772_v6, %v764_v5 }
 0x1a4   :  { %1969 = vmatpush1.bf16.msra.mxu1 %v1968_v22  ;;  %2097 = vmatpush1.bf16.msra.mxu0 %v2096_v23  ;;  %v2116_v22 = vpack.c.bf16 %v693_v16, %v685_v15  ;;  %v699_v23 = vld [vmem:[#allocation11 + $0x400] sm:$0xff]  ;;  %v773_v15 = vld [vmem:[#allocation11 + $0x650] sm:$0xff]  ;;  %v780_v16 = vld [vmem:[#allocation11 + $0x688] sm:$0xff] }
 0x1a5   :  { %1971 = vmatprep.subr.bf16.mxu1 %v1970_v26  ;;  %2099 = vmatprep.subr.bf16.mxu0 %v2098_v27  ;;  %v2118_v26 = vpack.c.bf16 %v710_v20, %v702_v19  ;;  %v701_v27 = vld [vmem:[#allocation11 + $0x410] sm:$0xff]  ;;  %v1992_v33 = vpack.c.bf16 %v707_v24, %v699_v23  ;;  %v790_v19 = vld [vmem:[#allocation11 + $0x6d8] sm:$0xff]  ;;  %v787_v23 = vld [vmem:[#allocation11 + $0x6c0] sm:$0xff]  ;;  %v2010_v24 = vpack.c.bf16 %v788_v17, %v780_v16 }
 0x1a6   :  { %v852_v16 = vld [vmem:[#allocation11 + $0x8c8] sm:$0xff]  ;;  %v846_v17 = vld [vmem:[#allocation11 + $0x898] sm:$0xff] }
 0x1a8   :  { %1973 = vmatpush1.bf16.msra.mxu1 %v1972_v34  ;;  %2101 = vmatpush1.bf16.msra.mxu0 %v2100_v35  ;;  %v2120_v34 = vpack.c.bf16 %v709_v28, %v701_v27  ;;  %v715_v35 = vld [vmem:[#allocation11 + $0x480] sm:$0xff]  ;;  %v789_v27 = vld [vmem:[#allocation11 + $0x6d0] sm:$0xff]  ;;  %v796_v28 = vld [vmem:[#allocation11 + $0x708] sm:$0xff] }
 0x1a9   :  { %1975 = vmatprep.subr.bf16.mxu1 %v1974_v38  ;;  %2103 = vmatprep.subr.bf16.mxu0 %v2102_v39  ;;  %v2122_v38 = vpack.c.bf16 %v726_v32, %v718_v31  ;;  %v717_v39 = vld [vmem:[#allocation11 + $0x490] sm:$0xff]  ;;  %v1996_v49 = vpack.c.bf16 %v723_v36, %v715_v35  ;;  %v806_v31 = vld [vmem:[#allocation11 + $0x758] sm:$0xff]  ;;  %v2014_v35 = vpack.c.bf16 %v804_v29, %v796_v28 }
 0x1aa   :  { %v2142_v36 = vpack.c.bf16 %v806_v31, %v798_v30  ;;  %v868_v30 = vld [vmem:[#allocation11 + $0x948] sm:$0xff]  ;;  %v862_v31 = vld [vmem:[#allocation11 + $0x918] sm:$0xff] }
 0x1ac   :  { %1977 = vmatpush1.bf16.msra.mxu1 %v1976_v50  ;;  %2105 = vmatpush1.bf16.msra.mxu0 %v2104_v51  ;;  %v2124_v50 = vpack.c.bf16 %v725_v40, %v717_v39  ;;  %v731_v51 = vld [vmem:[#allocation11 + $0x500] sm:$0xff]  ;;  %v805_v39 = vld [vmem:[#allocation11 + $0x750] sm:$0xff] }
 0x1ad   :  { %1979 = vmatprep.subr.bf16.mxu1 %v1978_v54  ;;  %2107 = vmatprep.subr.bf16.mxu0 %v2106_v55  ;;  %v2126_v54 = vpack.c.bf16 %v742_v48, %v734_v47  ;;  %v733_v55 = vld [vmem:[#allocation11 + $0x510] sm:$0xff]  ;;  %v2000_v61 = vpack.c.bf16 %v739_v52, %v731_v51  ;;  %v820_v47 = vld [vmem:[#allocation11 + $0x7c8] sm:$0xff]  ;;  %v814_v48 = vld [vmem:[#allocation11 + $0x798] sm:$0xff] }
 0x1ae   :  { %v811_v51 = vld [vmem:[#allocation11 + $0x780] sm:$0xff] }
 0x1af   :  { %v819_v52 = vld [vmem:[#allocation11 + $0x7c0] sm:$0xff] }
 0x1b0   :  { %1981 = vmatpush1.bf16.msra.mxu1 %v1980_v62  ;;  %2109 = vmatpush1.bf16.msra.mxu0 %v2108_v63  ;;  %v2128_v62 = vpack.c.bf16 %v741_v56, %v733_v55  ;;  %v747_v63 = vld [vmem:[#allocation11 + $0x580] sm:$0xff]  ;;  %v813_v55 = vld [vmem:[#allocation11 + $0x790] sm:$0xff] }
 0x1b1   :  { %1983 = vmatprep.subr.bf16.mxu1 %v1982_v2  ;;  %2111 = vmatprep.subr.bf16.mxu0 %v2110_v3  ;;  %v2130_v2 = vpack.c.bf16 %v758_v60, %v750_v59  ;;  %v749_v3 = vld [vmem:[#allocation11 + $0x590] sm:$0xff]  ;;  %v2004_v41 = vpack.c.bf16 %v755_v0, %v747_v63  ;;  %v836_v59 = vld [vmem:[#allocation11 + $0x848] sm:$0xff]  ;;  %v830_v60 = vld [vmem:[#allocation11 + $0x818] sm:$0xff] }
 0x1b2   :  { %v821_v56 = vld [vmem:[#allocation11 + $0x7d0] sm:$0xff]  ;;  %v2841_v0 = vld [vmem:[#allocation10] sm:$0xf] }
 0x1b3   :  { %v2148_v57 = vpack.c.bf16 %v821_v56, %v813_v55  ;;  %v877_v56 = vld [vmem:[#allocation11 + $0x990] sm:$0xff] }
 0x1b4   :  { %1985 = vmatpush1.bf16.msra.mxu1 %v1984_v9  ;;  %2113 = vmatpush1.bf16.msra.mxu0 %v2112_v10  ;;  %v2132_v9 = vpack.c.bf16 %v757_v4, %v749_v3  ;;  %v763_v10 = vld [vmem:[#allocation11 + $0x600] sm:$0xff]  ;;  %v412_v3 = vrot.slane %v2841_v0, %v2837_v46 }
 0x1b5   :  { %1987 = vmatprep.subr.bf16.mxu1 %v1986_v13  ;;  %2115 = vmatprep.subr.bf16.mxu0 %v2114_v14  ;;  %v2134_v13 = vpack.c.bf16 %v774_v8, %v766_v7  ;;  %v765_v14 = vld [vmem:[#allocation11 + $0x610] sm:$0xff]  ;;  %v2008_v20 = vpack.c.bf16 %v771_v11, %v763_v10  ;;  %v827_v7 = vld [vmem:[#allocation11 + $0x800] sm:$0xff] }
 0x1b6   :  { %v835_v10 = vld [vmem:[#allocation11 + $0x840] sm:$0xff]  ;;  %v829_v11 = vld [vmem:[#allocation11 + $0x810] sm:$0xff] }
 0x1b8   :  { %1989 = vmatpush1.bf16.msra.mxu1 %v1988_v21  ;;  %2117 = vmatpush1.bf16.msra.mxu0 %v2116_v22  ;;  %v2136_v21 = vpack.c.bf16 %v773_v15, %v765_v14  ;;  %v779_v22 = vld [vmem:[#allocation11 + $0x680] sm:$0xff]  ;;  %v844_v14 = vld [vmem:[#allocation11 + $0x888] sm:$0xff] }
 0x1b9   :  { %1991 = vmatprep.subr.bf16.mxu1 %v1990_v25  ;;  %2119 = vmatprep.subr.bf16.mxu0 %v2118_v26  ;;  %v2138_v25 = vpack.c.bf16 %v790_v19, %v782_v18  ;;  %v781_v26 = vld [vmem:[#allocation11 + $0x690] sm:$0xff]  ;;  %v2012_v32 = vpack.c.bf16 %v787_v23, %v779_v22  ;;  %v854_v18 = vld [vmem:[#allocation11 + $0x8d8] sm:$0xff]  ;;  %v843_v22 = vld [vmem:[#allocation11 + $0x880] sm:$0xff]  ;;  %v2026_v28 = vpack.c.bf16 %v852_v16, %v844_v14 }
 0x1ba   :  { %v851_v23 = vld [vmem:[#allocation11 + $0x8c0] sm:$0xff]  ;;  %v2154_v29 = vpack.c.bf16 %v854_v18, %v846_v17  ;;  %v909_v18 = vld [vmem:[#allocation11 + $0xa90] sm:$0xff] }
 0x1bb   :  { %v907_v14 = vld [vmem:[#allocation11 + $0xa80] sm:$0xff] }
 0x1bc   :  { %1993 = vmatpush1.bf16.msra.mxu1 %v1992_v33  ;;  %2121 = vmatpush1.bf16.msra.mxu0 %v2120_v34  ;;  %v2140_v33 = vpack.c.bf16 %v789_v27, %v781_v26  ;;  %v795_v34 = vld [vmem:[#allocation11 + $0x700] sm:$0xff]  ;;  %v853_v26 = vld [vmem:[#allocation11 + $0x8d0] sm:$0xff]  ;;  %v860_v27 = vld [vmem:[#allocation11 + $0x908] sm:$0xff] }
 0x1bd   :  { %1995 = vmatprep.subr.bf16.mxu1 %v1994_v37  ;;  %2123 = vmatprep.subr.bf16.mxu0 %v2122_v38  ;;  %v803_v37 = vld [vmem:[#allocation11 + $0x740] sm:$0xff]  ;;  %v797_v38 = vld [vmem:[#allocation11 + $0x710] sm:$0xff] }
 0x1be   :  { %v2016_v40 = vpack.c.bf16 %v803_v37, %v795_v34  ;;  %v2144_v42 = vpack.c.bf16 %v805_v39, %v797_v38  ;;  %v2028_v34 = vpack.c.bf16 %v851_v23, %v843_v22  ;;  %v867_v37 = vld [vmem:[#allocation11 + $0x940] sm:$0xff]  ;;  %v2030_v38 = vpack.c.bf16 %v868_v30, %v860_v27  ;;  %v932_v22 = vld [vmem:[#allocation11 + $0xb48] sm:$0xff]  ;;  %v926_v23 = vld [vmem:[#allocation11 + $0xb18] sm:$0xff] }
 0x1c0   :  { %1997 = vmatpush1.bf16.msra.mxu1 %v1996_v49  ;;  %2125 = vmatpush1.bf16.msra.mxu0 %v2124_v50  ;;  %v2018_v49 = vpack.c.bf16 %v820_v47, %v812_v45  ;;  %v822_v50 = vld [vmem:[#allocation11 + $0x7d8] sm:$0xff]  ;;  %v876_v45 = vld [vmem:[#allocation11 + $0x988] sm:$0xff] }
 0x1c1   :  { %1999 = vmatprep.subr.bf16.mxu1 %v1998_v53  ;;  %2127 = vmatprep.subr.bf16.mxu0 %v2126_v54  ;;  %v2146_v53 = vpack.c.bf16 %v822_v50, %v814_v48  ;;  %v2020_v54 = vpack.c.bf16 %v819_v52, %v811_v51  ;;  %v884_v47 = vld [vmem:[#allocation11 + $0x9c8] sm:$0xff]  ;;  %v878_v48 = vld [vmem:[#allocation11 + $0x998] sm:$0xff]  ;;  %v875_v52 = vld [vmem:[#allocation11 + $0x980] sm:$0xff] }
 0x1c4   :  { %2001 = vmatpush1.bf16.msra.mxu1 %v2000_v61  ;;  %2129 = vmatpush1.bf16.msra.mxu0 %v2128_v62  ;;  %v2022_v61 = vpack.c.bf16 %v836_v59, %v828_v58  ;;  %v838_v62 = vld [vmem:[#allocation11 + $0x858] sm:$0xff]  ;;  %v892_v58 = vld [vmem:[#allocation11 + $0xa08] sm:$0xff] }
 0x1c5   :  { %2003 = vmatprep.subr.bf16.mxu1 %v2002_v1  ;;  %2131 = vmatprep.subr.bf16.mxu0 %v2130_v2  ;;  %v2150_v63 = vpack.c.bf16 %v838_v62, %v830_v60  ;;  %v419_v1 = vsub.s32 3, %v2831_v43  ;;  %v408_v2 = vrot.slane %v2841_v0, %v2834_v44  ;;  %v900_v59 = vld [vmem:[#allocation11 + $0xa48] sm:$0xff]  ;;  %v894_v60 = vld [vmem:[#allocation11 + $0xa18] sm:$0xff] }
 0x1c7   :  { %v420_v4 = vrot.slane %v2841_v0, %v419_v1 }
 0x1c8   :  { %2005 = vmatpush1.bf16.msra.mxu1 %v2004_v41  ;;  %2133 = vmatpush1.bf16.msra.mxu0 %v2132_v9 }
 0x1c9   :  { %2007 = vmatprep.subr.bf16.mxu1 %v2006_v12  ;;  %2135 = vmatprep.subr.bf16.mxu0 %v2134_v13  ;;  %v837_v12 = vld [vmem:[#allocation11 + $0x850] sm:$0xff] }
 0x1cc   :  { %2009 = vmatpush1.bf16.msra.mxu1 %v2008_v20  ;;  %2137 = vmatpush1.bf16.msra.mxu0 %v2136_v21  ;;  %v2024_v20 = vpack.c.bf16 %v835_v10, %v827_v7  ;;  %v2152_v21 = vpack.c.bf16 %v837_v12, %v829_v11  ;;  %v893_v7 = vld [vmem:[#allocation11 + $0xa10] sm:$0xff]  ;;  %v910_v10 = vld [vmem:[#allocation11 + $0xa98] sm:$0xff] }
 0x1cd   :  { %2011 = vmatprep.subr.bf16.mxu1 %v2010_v24  ;;  %2139 = vmatprep.subr.bf16.mxu0 %v2138_v25  ;;  %v845_v25 = vld [vmem:[#allocation11 + $0x890] sm:$0xff]  ;;  %v918_v11 = vld [vmem:[#allocation11 + $0xad8] sm:$0xff] }
 0x1ce   :  { %v2170_v17 = vpack.c.bf16 %v918_v11, %v910_v10  ;;  %v973_v11 = vld [vmem:[#allocation11 + $0xc90] sm:$0xff] }
 0x1d0   :  { %2013 = vmatpush1.bf16.msra.mxu1 %v2012_v32  ;;  %2141 = vmatpush1.bf16.msra.mxu0 %v2140_v33  ;;  %v870_v32 = vld [vmem:[#allocation11 + $0x958] sm:$0xff] }
 0x1d1   :  { %2015 = vmatprep.subr.bf16.mxu1 %v2014_v35  ;;  %2143 = vmatprep.subr.bf16.mxu0 %v2142_v36  ;;  %v2156_v35 = vpack.c.bf16 %v853_v26, %v845_v25  ;;  %v859_v36 = vld [vmem:[#allocation11 + $0x900] sm:$0xff]  ;;  %v2158_v39 = vpack.c.bf16 %v870_v32, %v862_v31  ;;  %v934_v25 = vld [vmem:[#allocation11 + $0xb58] sm:$0xff]  ;;  %v925_v32 = vld [vmem:[#allocation11 + $0xb10] sm:$0xff] }
 0x1d2   :  { %v2032_v50 = vpack.c.bf16 %v867_v37, %v859_v36  ;;  %v2174_v31 = vpack.c.bf16 %v934_v25, %v926_v23  ;;  %v948_v36 = vld [vmem:[#allocation11 + $0xbc8] sm:$0xff]  ;;  %v942_v37 = vld [vmem:[#allocation11 + $0xb98] sm:$0xff]  ;;  %v989_v25 = vld [vmem:[#allocation11 + $0xd10] sm:$0xff] }
 0x1d4   :  { %2017 = vmatpush1.bf16.msra.mxu1 %v2016_v40  ;;  %2145 = vmatpush1.bf16.msra.mxu0 %v2144_v42  ;;  %v861_v40 = vld [vmem:[#allocation11 + $0x910] sm:$0xff] }
 0x1d5   :  { %2019 = vmatprep.subr.bf16.mxu1 %v2018_v49  ;;  %2147 = vmatprep.subr.bf16.mxu0 %v2146_v53  ;;  %v869_v42 = vld [vmem:[#allocation11 + $0x950] sm:$0xff]  ;;  %v886_v49 = vld [vmem:[#allocation11 + $0x9d8] sm:$0xff]  ;;  %v883_v53 = vld [vmem:[#allocation11 + $0x9c0] sm:$0xff] }
 0x1d6   :  { %v2160_v51 = vpack.c.bf16 %v869_v42, %v861_v40  ;;  %v2162_v55 = vpack.c.bf16 %v886_v49, %v878_v48  ;;  %v2036_v62 = vpack.c.bf16 %v883_v53, %v875_v52  ;;  %v939_v42 = vld [vmem:[#allocation11 + $0xb80] sm:$0xff]  ;;  %v941_v49 = vld [vmem:[#allocation11 + $0xb90] sm:$0xff]  ;;  %v964_v52 = vld [vmem:[#allocation11 + $0xc48] sm:$0xff] }
 0x1d7   :  { %v958_v53 = vld [vmem:[#allocation11 + $0xc18] sm:$0xff] }
 0x1d8   :  { %2021 = vmatpush1.bf16.msra.mxu1 %v2020_v54  ;;  %2149 = vmatpush1.bf16.msra.mxu0 %v2148_v57  ;;  %v2034_v54 = vpack.c.bf16 %v884_v47, %v876_v45  ;;  %v885_v57 = vld [vmem:[#allocation11 + $0x9d0] sm:$0xff]  ;;  %v947_v45 = vld [vmem:[#allocation11 + $0xbc0] sm:$0xff] }
 0x1d9   :  { %2023 = vmatprep.subr.bf16.mxu1 %v2022_v61  ;;  %2151 = vmatprep.subr.bf16.mxu0 %v2150_v63  ;;  %v902_v61 = vld [vmem:[#allocation11 + $0xa58] sm:$0xff]  ;;  %v2164_v63 = vpack.c.bf16 %v885_v57, %v877_v56  ;;  %v955_v57 = vld [vmem:[#allocation11 + $0xc00] sm:$0xff] }
 0x26e   :  { %v491_v5 = vpop.f32.mrb[0].mxu1  ;;  %v2851_v6 = vpop.f32.mrb[2].mxu0 }
 0x26f   :  { %v492_v8 = vadd.f32 %v491_v5, %v408_v2  ;;  %v493_v41 = vpop.f32.mrb[1].mxu1  ;;  %v564_v9 = vpop.f32.mrb[3].mxu0  ;;  %v891_v2 = vld [vmem:[#allocation11 + $0xa00] sm:$0xff]  ;;  %v2166_v5 = vpack.c.bf16 %v902_v61, %v894_v60  ;;  %v957_v61 = vld [vmem:[#allocation11 + $0xc10] sm:$0xff] }
 0x270   :  { %v494_v13 = vadd.f32 %v493_v41, %v412_v3  ;;  %v565_v15 = vadd.f32 %v564_v9, %v420_v4  ;;  %v899_v3 = vld [vmem:[#allocation11 + $0xa40] sm:$0xff]  ;;  %v2038_v4 = vpack.c.bf16 %v900_v59, %v892_v58  ;;  %v908_v41 = vld [vmem:[#allocation11 + $0xa88] sm:$0xff] }
 0x271   :  { %v2855_v24 = vmax.f32 %v492_v8, 0.0  ;;  %v901_v8 = vld [vmem:[#allocation11 + $0xa50] sm:$0xff]  ;;  %v916_v9 = vld [vmem:[#allocation11 + $0xac8] sm:$0xff]  ;;  %v2040_v12 = vpack.c.bf16 %v899_v3, %v891_v2  ;;  %v963_v58 = vld [vmem:[#allocation11 + $0xc40] sm:$0xff] }
 0x272   :  { %v2853_v19 = vmax.f32 %v494_v13, 0.0  ;;  %v2859_v33 = vmax.f32 %v565_v15, 0.0  ;;  %v2168_v13 = vpack.c.bf16 %v901_v8, %v893_v7  ;;  %v915_v15 = vld [vmem:[#allocation11 + $0xac0] sm:$0xff]  ;;  %v2042_v16 = vpack.c.bf16 %v916_v9, %v908_v41  ;;  %v980_v2 = vld [vmem:[#allocation11 + $0xcc8] sm:$0xff]  ;;  %v974_v3 = vld [vmem:[#allocation11 + $0xc98] sm:$0xff] }
 0x273   :  { %v2044_v26 = vpack.c.bf16 %v915_v15, %v907_v14  ;;  %v971_v8 = vld [vmem:[#allocation11 + $0xc80] sm:$0xff]  ;;  %v996_v14 = vld [vmem:[#allocation11 + $0xd48] sm:$0xff]  ;;  %v990_v15 = vld [vmem:[#allocation11 + $0xd18] sm:$0xff] }
 0x274   :  { %1189 = vmatprep.mubr.f32.mxu1 %v2853_v19  ;;  %1331 = vmatprep.mubr.f32.mxu0 %v2853_v19  ;;  %v979_v41 = vld [vmem:[#allocation11 + $0xcc0] sm:$0xff] }
 0x275   :  { %1190 = vmatmul.mubr.f32.vlgmr.msra.gmra.mrb[2].mxu1 %v2855_v24  ;;  %1332 = vmatmul.mubr.f32.vlgmr.msra.gmra.mrb[4].mxu0 %v2855_v24 }
 0x276   :  { %2025 = vmatpush1.bf16.msra.mxu1 %v2024_v20  ;;  %2153 = vmatpush1.bf16.msra.mxu0 %v2152_v21  ;;  %v917_v20 = vld [vmem:[#allocation11 + $0xad0] sm:$0xff]  ;;  %v924_v21 = vld [vmem:[#allocation11 + $0xb08] sm:$0xff] }
 0x277   :  { %1260 = vmatprep.mubr.f32.mxu1 %v2859_v33  ;;  %1402 = vmatprep.mubr.f32.mxu0 %v2859_v33  ;;  %v2172_v27 = vpack.c.bf16 %v917_v20, %v909_v18  ;;  %v2046_v30 = vpack.c.bf16 %v932_v22, %v924_v21  ;;  %v987_v20 = vld [vmem:[#allocation11 + $0xd00] sm:$0xff] }
 0x278   :  { %2027 = vmatprep.subr.bf16.mxu1 %v2026_v28  ;;  %2155 = vmatprep.subr.bf16.mxu0 %v2154_v29  ;;  %v923_v28 = vld [vmem:[#allocation11 + $0xb00] sm:$0xff] }
 0x279   :  { %v931_v29 = vld [vmem:[#allocation11 + $0xb40] sm:$0xff] }
 0x27a   :  { %2029 = vmatpush1.bf16.msra.mxu1 %v2028_v34  ;;  %2157 = vmatpush1.bf16.msra.mxu0 %v2156_v35  ;;  %v933_v34 = vld [vmem:[#allocation11 + $0xb50] sm:$0xff]  ;;  %v940_v35 = vld [vmem:[#allocation11 + $0xb88] sm:$0xff]  ;;  %v995_v21 = vld [vmem:[#allocation11 + $0xd40] sm:$0xff] }
 0x27b   :  { %2031 = vmatprep.subr.bf16.mxu1 %v2030_v38  ;;  %2159 = vmatprep.subr.bf16.mxu0 %v2158_v39  ;;  %v950_v38 = vld [vmem:[#allocation11 + $0xbd8] sm:$0xff]  ;;  %v2048_v39 = vpack.c.bf16 %v931_v29, %v923_v28  ;;  %v2176_v40 = vpack.c.bf16 %v933_v34, %v925_v32  ;;  %v2050_v47 = vpack.c.bf16 %v948_v36, %v940_v35  ;;  %v1012_v28 = vld [vmem:[#allocation11 + $0xdc8] sm:$0xff]  ;;  %v1003_v34 = vld [vmem:[#allocation11 + $0xd80] sm:$0xff] }
 0x27c   :  { %v2178_v48 = vpack.c.bf16 %v950_v38, %v942_v37  ;;  %v1006_v29 = vld [vmem:[#allocation11 + $0xd98] sm:$0xff]  ;;  %v1011_v35 = vld [vmem:[#allocation11 + $0xdc0] sm:$0xff]  ;;  %v1005_v38 = vld [vmem:[#allocation11 + $0xd90] sm:$0xff] }
 0x27e   :  { %2033 = vmatpush1.bf16.msra.mxu1 %v2032_v50  ;;  %2161 = vmatpush1.bf16.msra.mxu0 %v2160_v51  ;;  %v949_v50 = vld [vmem:[#allocation11 + $0xbd0] sm:$0xff]  ;;  %v956_v51 = vld [vmem:[#allocation11 + $0xc08] sm:$0xff] }
 0x27f   :  { %2035 = vmatprep.subr.bf16.mxu1 %v2034_v54  ;;  %2163 = vmatprep.subr.bf16.mxu0 %v2162_v55  ;;  %v966_v54 = vld [vmem:[#allocation11 + $0xc58] sm:$0xff]  ;;  %v2052_v55 = vpack.c.bf16 %v947_v45, %v939_v42  ;;  %v2180_v56 = vpack.c.bf16 %v949_v50, %v941_v49  ;;  %v2054_v59 = vpack.c.bf16 %v964_v52, %v956_v51  ;;  %v1028_v42 = vld [vmem:[#allocation11 + $0xe48] sm:$0xff]  ;;  %v1019_v50 = vld [vmem:[#allocation11 + $0xe00] sm:$0xff] }
 0x280   :  { %v2182_v60 = vpack.c.bf16 %v966_v54, %v958_v53  ;;  %v1022_v45 = vld [vmem:[#allocation11 + $0xe18] sm:$0xff]  ;;  %v1027_v51 = vld [vmem:[#allocation11 + $0xe40] sm:$0xff]  ;;  %v1021_v54 = vld [vmem:[#allocation11 + $0xe10] sm:$0xff] }
 0x282   :  { %2037 = vmatpush1.bf16.msra.mxu1 %v2036_v62  ;;  %2165 = vmatpush1.bf16.msra.mxu0 %v2164_v63  ;;  %v965_v62 = vld [vmem:[#allocation11 + $0xc50] sm:$0xff]  ;;  %v972_v63 = vld [vmem:[#allocation11 + $0xc88] sm:$0xff] }
 0x283   :  { %2039 = vmatprep.subr.bf16.mxu1 %v2038_v4  ;;  %2167 = vmatprep.subr.bf16.mxu0 %v2166_v5  ;;  %v982_v4 = vld [vmem:[#allocation11 + $0xcd8] sm:$0xff]  ;;  %v2056_v5 = vpack.c.bf16 %v963_v58, %v955_v57  ;;  %v2184_v7 = vpack.c.bf16 %v965_v62, %v957_v61  ;;  %v2058_v9 = vpack.c.bf16 %v980_v2, %v972_v63  ;;  %v1044_v57 = vld [vmem:[#allocation11 + $0xec8] sm:$0xff]  ;;  %v1035_v62 = vld [vmem:[#allocation11 + $0xe80] sm:$0xff] }
 0x284   :  { %v2186_v10 = vpack.c.bf16 %v982_v4, %v974_v3  ;;  %v1038_v58 = vld [vmem:[#allocation11 + $0xe98] sm:$0xff]  ;;  %v1043_v63 = vld [vmem:[#allocation11 + $0xec0] sm:$0xff]  ;;  %v1037_v4 = vld [vmem:[#allocation11 + $0xe90] sm:$0xff] }
 0x286   :  { %2041 = vmatpush1.bf16.msra.mxu1 %v2040_v12  ;;  %2169 = vmatpush1.bf16.msra.mxu0 %v2168_v13  ;;  %v981_v12 = vld [vmem:[#allocation11 + $0xcd0] sm:$0xff]  ;;  %v988_v13 = vld [vmem:[#allocation11 + $0xd08] sm:$0xff] }
 0x287   :  { %2043 = vmatprep.subr.bf16.mxu1 %v2042_v16  ;;  %2171 = vmatprep.subr.bf16.mxu0 %v2170_v17  ;;  %v998_v16 = vld [vmem:[#allocation11 + $0xd58] sm:$0xff]  ;;  %v2060_v17 = vpack.c.bf16 %v979_v41, %v971_v8  ;;  %v2188_v18 = vpack.c.bf16 %v981_v12, %v973_v11  ;;  %v2062_v22 = vpack.c.bf16 %v996_v14, %v988_v13  ;;  %v1060_v8 = vld [vmem:[#allocation11 + $0xf48] sm:$0xff]  ;;  %v1051_v12 = vld [vmem:[#allocation11 + $0xf00] sm:$0xff]  ;;  %v415_v14 = vsub.s32 2, %v2831_v43 }
 0x288   :  { %v2190_v23 = vpack.c.bf16 %v998_v16, %v990_v15  ;;  %v1054_v41 = vld [vmem:[#allocation11 + $0xf18] sm:$0xff]  ;;  %v1059_v13 = vld [vmem:[#allocation11 + $0xf40] sm:$0xff] }
 0x28a   :  { %2045 = vmatpush1.bf16.msra.mxu1 %v2044_v26  ;;  %2173 = vmatpush1.bf16.msra.mxu0 %v2172_v27  ;;  %v997_v26 = vld [vmem:[#allocation11 + $0xd50] sm:$0xff]  ;;  %v1004_v27 = vld [vmem:[#allocation11 + $0xd88] sm:$0xff] }
 0x28b   :  { %2047 = vmatprep.subr.bf16.mxu1 %v2046_v30  ;;  %2175 = vmatprep.subr.bf16.mxu0 %v2174_v31  ;;  %v1014_v30 = vld [vmem:[#allocation11 + $0xdd8] sm:$0xff]  ;;  %v2064_v31 = vpack.c.bf16 %v995_v21, %v987_v20  ;;  %v2192_v32 = vpack.c.bf16 %v997_v26, %v989_v25  ;;  %v2066_v36 = vpack.c.bf16 %v1012_v28, %v1004_v27  ;;  %v1068_v20 = vld [vmem:[#allocation11 + $0xf88] sm:$0xff]  ;;  %v1067_v27 = vld [vmem:[#allocation11 + $0xf80] sm:$0xff] }
 0x28c   :  { %v2194_v37 = vpack.c.bf16 %v1014_v30, %v1006_v29  ;;  %v1076_v21 = vld [vmem:[#allocation11 + $0xfc8] sm:$0xff]  ;;  %v2080_v25 = vpack.c.bf16 %v1059_v13, %v1051_v12  ;;  %v1075_v28 = vld [vmem:[#allocation11 + $0xfc0] sm:$0xff]  ;;  %v416_v29 = vrot.slane %v2841_v0, %v415_v14  ;;  %v617_v12 = vld [vmem:[#allocation11 + $0x170] sm:$0xff] }
 0x28d   :  { %v2082_v30 = vpack.c.bf16 %v1076_v21, %v1068_v20  ;;  %v624_v13 = vld [vmem:[#allocation11 + $0x1a8] sm:$0xff] }
 0x28e   :  { %2049 = vmatpush1.bf16.msra.mxu1 %v2048_v39  ;;  %2177 = vmatpush1.bf16.msra.mxu0 %v2176_v40  ;;  %v1013_v39 = vld [vmem:[#allocation11 + $0xdd0] sm:$0xff]  ;;  %v1020_v40 = vld [vmem:[#allocation11 + $0xe08] sm:$0xff] }
 0x28f   :  { %2051 = vmatprep.subr.bf16.mxu1 %v2050_v47  ;;  %2179 = vmatprep.subr.bf16.mxu0 %v2178_v48  ;;  %v1030_v47 = vld [vmem:[#allocation11 + $0xe58] sm:$0xff]  ;;  %v2068_v48 = vpack.c.bf16 %v1011_v35, %v1003_v34  ;;  %v2196_v49 = vpack.c.bf16 %v1013_v39, %v1005_v38  ;;  %v2070_v52 = vpack.c.bf16 %v1028_v42, %v1020_v40  ;;  %v1077_v34 = vld [vmem:[#allocation11 + $0xfd0] sm:$0xff]  ;;  %v576_v35 = vld [vmem:[#allocation11 + $0x28] sm:$0xff] }
 0x290   :  { %v2198_v53 = vpack.c.bf16 %v1030_v47, %v1022_v45  ;;  %v586_v38 = vld [vmem:[#allocation11 + $0x78] sm:$0xff]  ;;  %v2084_v39 = vpack.c.bf16 %v1075_v28, %v1067_v27  ;;  %v563_v42 = vadd.f32 %v2851_v6, %v416_v29  ;;  %v575_v47 = vld [vmem:[#allocation11 + $0x20] sm:$0xff]  ;;  %v640_v27 = vld [vmem:[#allocation11 + $0x228] sm:$0xff] }
 0x291   :  { %v648_v28 = vld [vmem:[#allocation11 + $0x268] sm:$0xff]  ;;  %v642_v29 = vld [vmem:[#allocation11 + $0x238] sm:$0xff] }
 0x292   :  { %2053 = vmatpush1.bf16.msra.mxu1 %v2052_v55  ;;  %2181 = vmatpush1.bf16.msra.mxu0 %v2180_v56  ;;  %v1029_v55 = vld [vmem:[#allocation11 + $0xe50] sm:$0xff]  ;;  %v1036_v56 = vld [vmem:[#allocation11 + $0xe88] sm:$0xff] }
 0x293   :  { %2055 = vmatprep.subr.bf16.mxu1 %v2054_v59  ;;  %2183 = vmatprep.subr.bf16.mxu0 %v2182_v60  ;;  %v1046_v59 = vld [vmem:[#allocation11 + $0xed8] sm:$0xff]  ;;  %v2072_v60 = vpack.c.bf16 %v1027_v51, %v1019_v50  ;;  %v2200_v61 = vpack.c.bf16 %v1029_v55, %v1021_v54  ;;  %v2074_v2 = vpack.c.bf16 %v1044_v57, %v1036_v56  ;;  %v585_v50 = vld [vmem:[#allocation11 + $0x70] sm:$0xff]  ;;  %v592_v51 = vld [vmem:[#allocation11 + $0xa8] sm:$0xff]  ;;  %v2870_v56 = vmax.f32 %v563_v42, 0.0 }
 0x294   :  { %v2202_v3 = vpack.c.bf16 %v1046_v59, %v1038_v58  ;;  %v602_v54 = vld [vmem:[#allocation11 + $0xf8] sm:$0xff]  ;;  %v591_v57 = vld [vmem:[#allocation11 + $0xa0] sm:$0xff]  ;;  %v593_v59 = vld [vmem:[#allocation11 + $0xb0] sm:$0xff] }
 0x295   :  { %v599_v58 = vld [vmem:[#allocation11 + $0xe0] sm:$0xff]  ;;  %v664_v42 = vld [vmem:[#allocation11 + $0x2e8] sm:$0xff] }
 0x296   :  { %2057 = vmatpush1.bf16.msra.mxu1 %v2056_v5  ;;  %2185 = vmatpush1.bf16.msra.mxu0 %v2184_v7  ;;  %v1045_v5 = vld [vmem:[#allocation11 + $0xed0] sm:$0xff]  ;;  %v1052_v7 = vld [vmem:[#allocation11 + $0xf08] sm:$0xff] }
 0x297   :  { %2059 = vmatprep.subr.bf16.mxu1 %v2058_v9  ;;  %2187 = vmatprep.subr.bf16.mxu0 %v2186_v10  ;;  %v1062_v9 = vld [vmem:[#allocation11 + $0xf58] sm:$0xff]  ;;  %v2076_v10 = vpack.c.bf16 %v1043_v63, %v1035_v62  ;;  %v2204_v11 = vpack.c.bf16 %v1045_v5, %v1037_v4  ;;  %v2078_v15 = vpack.c.bf16 %v1060_v8, %v1052_v7  ;;  %v601_v62 = vld [vmem:[#allocation11 + $0xf0] sm:$0xff]  ;;  %v608_v63 = vld [vmem:[#allocation11 + $0x128] sm:$0xff] }
 0x298   :  { %v2206_v16 = vpack.c.bf16 %v1062_v9, %v1054_v41  ;;  %v618_v4 = vld [vmem:[#allocation11 + $0x178] sm:$0xff]  ;;  %v2220_v5 = vpack.c.bf16 %v599_v58, %v591_v57  ;;  %v2348_v7 = vpack.c.bf16 %v601_v62, %v593_v59  ;;  %v607_v41 = vld [vmem:[#allocation11 + $0x120] sm:$0xff] }
 0x299   :  { %v615_v9 = vld [vmem:[#allocation11 + $0x160] sm:$0xff]  ;;  %v674_v57 = vld [vmem:[#allocation11 + $0x338] sm:$0xff] }
 0x29a   :  { %2061 = vmatpush1.bf16.msra.mxu1 %v2060_v17  ;;  %2189 = vmatpush1.bf16.msra.mxu0 %v2188_v18  ;;  %v1053_v17 = vld [vmem:[#allocation11 + $0xf10] sm:$0xff]  ;;  %v682_v58 = vld [vmem:[#allocation11 + $0x378] sm:$0xff]  ;;  %v671_v62 = vld [vmem:[#allocation11 + $0x320] sm:$0xff] }
 0x29b   :  { %2063 = vmatprep.subr.bf16.mxu1 %v2062_v22  ;;  %2191 = vmatprep.subr.bf16.mxu0 %v2190_v23  ;;  %v1061_v18 = vld [vmem:[#allocation11 + $0xf50] sm:$0xff]  ;;  %v1070_v22 = vld [vmem:[#allocation11 + $0xf98] sm:$0xff] }
 0x29c   :  { %v1078_v23 = vld [vmem:[#allocation11 + $0xfd8] sm:$0xff]  ;;  %v2208_v26 = vpack.c.bf16 %v1061_v18, %v1053_v17  ;;  %v2224_v18 = vpack.c.bf16 %v615_v9, %v607_v41 }
 0x29d   :  { %v634_v17 = vld [vmem:[#allocation11 + $0x1f8] sm:$0xff] }
 0x29e   :  { %2065 = vmatpush1.bf16.msra.mxu1 %v2064_v31  ;;  %2193 = vmatpush1.bf16.msra.mxu0 %v2192_v32  ;;  %v2210_v31 = vpack.c.bf16 %v1078_v23, %v1070_v22  ;;  %v1069_v32 = vld [vmem:[#allocation11 + $0xf90] sm:$0xff]  ;;  %v631_v22 = vld [vmem:[#allocation11 + $0x1e0] sm:$0xff]  ;;  %v698_v41 = vld [vmem:[#allocation11 + $0x3f8] sm:$0xff] }
 0x29f   :  { %2067 = vmatprep.subr.bf16.mxu1 %v2066_v36  ;;  %2195 = vmatprep.subr.bf16.mxu0 %v2194_v37  ;;  %v584_v36 = vld [vmem:[#allocation11 + $0x68] sm:$0xff]  ;;  %v578_v37 = vld [vmem:[#allocation11 + $0x38] sm:$0xff]  ;;  %v2212_v40 = vpack.c.bf16 %v1077_v34, %v1069_v32  ;;  %v625_v23 = vld [vmem:[#allocation11 + $0x1b0] sm:$0xff]  ;;  %v2230_v34 = vpack.c.bf16 %v648_v28, %v640_v27 }
 0x2a0   :  { %v2214_v45 = vpack.c.bf16 %v584_v36, %v576_v35  ;;  %v2342_v0 = vpack.c.bf16 %v586_v38, %v578_v37  ;;  %v639_v35 = vld [vmem:[#allocation11 + $0x220] sm:$0xff]  ;;  %v641_v37 = vld [vmem:[#allocation11 + $0x230] sm:$0xff] }
 0x2a1   :  { %v647_v36 = vld [vmem:[#allocation11 + $0x260] sm:$0xff]  ;;  %v705_v28 = vld [vmem:[#allocation11 + $0x430] sm:$0xff] }
 0x2a2   :  { %2069 = vmatpush1.bf16.msra.mxu1 %v2068_v48  ;;  %2197 = vmatpush1.bf16.msra.mxu0 %v2196_v49  ;;  %v583_v48 = vld [vmem:[#allocation11 + $0x60] sm:$0xff]  ;;  %v577_v49 = vld [vmem:[#allocation11 + $0x30] sm:$0xff] }
 0x2a3   :  { %2071 = vmatprep.subr.bf16.mxu1 %v2070_v52  ;;  %2199 = vmatprep.subr.bf16.mxu0 %v2198_v53  ;;  %v600_v52 = vld [vmem:[#allocation11 + $0xe8] sm:$0xff]  ;;  %v594_v53 = vld [vmem:[#allocation11 + $0xb8] sm:$0xff]  ;;  %v2216_v55 = vpack.c.bf16 %v583_v48, %v575_v47  ;;  %v2344_v6 = vpack.c.bf16 %v585_v50, %v577_v49  ;;  %v2232_v47 = vpack.c.bf16 %v647_v36, %v639_v35  ;;  %v655_v50 = vld [vmem:[#allocation11 + $0x2a0] sm:$0xff] }
 0x2a4   :  { %v711_v27 = vld [vmem:[#allocation11 + $0x460] sm:$0xff]  ;;  %v730_v35 = vld [vmem:[#allocation11 + $0x4f8] sm:$0xff] }
 0x2a6   :  { %2073 = vmatpush1.bf16.msra.mxu1 %v2072_v60  ;;  %2201 = vmatpush1.bf16.msra.mxu0 %v2200_v61  ;;  %v2218_v60 = vpack.c.bf16 %v600_v52, %v592_v51  ;;  %v2346_v61 = vpack.c.bf16 %v602_v54, %v594_v53  ;;  %v663_v51 = vld [vmem:[#allocation11 + $0x2e0] sm:$0xff]  ;;  %v657_v52 = vld [vmem:[#allocation11 + $0x2b0] sm:$0xff] }
 0x2a7   :  { %2075 = vmatprep.subr.bf16.mxu1 %v2074_v2  ;;  %2203 = vmatprep.subr.bf16.mxu0 %v2202_v3  ;;  %v616_v2 = vld [vmem:[#allocation11 + $0x168] sm:$0xff]  ;;  %v610_v3 = vld [vmem:[#allocation11 + $0x138] sm:$0xff]  ;;  %v665_v54 = vld [vmem:[#allocation11 + $0x2f0] sm:$0xff]  ;;  %v2236_v59 = vpack.c.bf16 %v663_v51, %v655_v50 }
 0x2a8   :  { %v2222_v8 = vpack.c.bf16 %v616_v2, %v608_v63  ;;  %v679_v63 = vld [vmem:[#allocation11 + $0x360] sm:$0xff]  ;;  %v673_v2 = vld [vmem:[#allocation11 + $0x330] sm:$0xff]  ;;  %v746_v50 = vld [vmem:[#allocation11 + $0x578] sm:$0xff] }
 0x2a9   :  { %v2240_v9 = vpack.c.bf16 %v679_v63, %v671_v62  ;;  %v762_v62 = vld [vmem:[#allocation11 + $0x5f8] sm:$0xff] }
 0x2aa   :  { %2077 = vmatpush1.bf16.msra.mxu1 %v2076_v10  ;;  %2205 = vmatpush1.bf16.msra.mxu0 %v2204_v11  ;;  %v609_v10 = vld [vmem:[#allocation11 + $0x130] sm:$0xff]  ;;  %v2350_v11 = vpack.c.bf16 %v618_v4, %v610_v3  ;;  %v2366_v3 = vpack.c.bf16 %v682_v58, %v674_v57 }
 0x2ab   :  { %2079 = vmatprep.subr.bf16.mxu1 %v2078_v15  ;;  %2207 = vmatprep.subr.bf16.mxu0 %v2206_v16  ;;  %v632_v15 = vld [vmem:[#allocation11 + $0x1e8] sm:$0xff]  ;;  %v626_v16 = vld [vmem:[#allocation11 + $0x1b8] sm:$0xff]  ;;  %v2352_v20 = vpack.c.bf16 %v617_v12, %v609_v10  ;;  %v681_v4 = vld [vmem:[#allocation11 + $0x370] sm:$0xff] }
 0x2ac   :  { %v2226_v21 = vpack.c.bf16 %v632_v15, %v624_v13  ;;  %v2368_v10 = vpack.c.bf16 %v681_v4, %v673_v2  ;;  %v687_v12 = vld [vmem:[#allocation11 + $0x3a0] sm:$0xff]  ;;  %v689_v15 = vld [vmem:[#allocation11 + $0x3b0] sm:$0xff] }
 0x2ad   :  { %v695_v13 = vld [vmem:[#allocation11 + $0x3e0] sm:$0xff]  ;;  %v745_v58 = vld [vmem:[#allocation11 + $0x570] sm:$0xff] }
 0x2ae   :  { %2081 = vmatpush1.bf16.msra.mxu1 %v2080_v25  ;;  %2209 = vmatpush1.bf16.msra.mxu0 %v2208_v26  ;;  %v2354_v25 = vpack.c.bf16 %v634_v17, %v626_v16  ;;  %v633_v26 = vld [vmem:[#allocation11 + $0x1f0] sm:$0xff]  ;;  %v751_v4 = vld [vmem:[#allocation11 + $0x5a0] sm:$0xff] }
 0x2af   :  { %2083 = vmatprep.subr.bf16.mxu1 %v2082_v30  ;;  %2211 = vmatprep.subr.bf16.mxu0 %v2210_v31  ;;  %v650_v30 = vld [vmem:[#allocation11 + $0x278] sm:$0xff]  ;;  %v2356_v32 = vpack.c.bf16 %v633_v26, %v625_v23  ;;  %v697_v17 = vld [vmem:[#allocation11 + $0x3f0] sm:$0xff]  ;;  %v703_v26 = vld [vmem:[#allocation11 + $0x420] sm:$0xff] }
 0x2b0   :  { %v2358_v38 = vpack.c.bf16 %v650_v30, %v642_v29  ;;  %v2372_v23 = vpack.c.bf16 %v697_v17, %v689_v15  ;;  %v713_v30 = vld [vmem:[#allocation11 + $0x470] sm:$0xff]  ;;  %v2248_v36 = vpack.c.bf16 %v711_v27, %v703_v26  ;;  %v767_v17 = vld [vmem:[#allocation11 + $0x620] sm:$0xff]  ;;  %v794_v26 = vld [vmem:[#allocation11 + $0x6f8] sm:$0xff] }
 0x2b2   :  { %2085 = vmatpush1.bf16.msra.mxu1 %v2084_v39  ;;  %2213 = vmatpush1.bf16.msra.mxu0 %v2212_v40  ;;  %v649_v39 = vld [vmem:[#allocation11 + $0x270] sm:$0xff]  ;;  %v656_v40 = vld [vmem:[#allocation11 + $0x2a8] sm:$0xff] }
 0x2b3   :  { %2215 = vmatprep.subr.bf16.mxu1 %v2214_v45  ;;  %2343 = vmatprep.subr.bf16.mxu0 %v2342_v0  ;;  %v658_v45 = vld [vmem:[#allocation11 + $0x2b8] sm:$0xff]  ;;  %v2360_v48 = vpack.c.bf16 %v649_v39, %v641_v37  ;;  %v2234_v49 = vpack.c.bf16 %v664_v42, %v656_v40  ;;  %v2376_v37 = vpack.c.bf16 %v713_v30, %v705_v28  ;;  %v719_v39 = vld [vmem:[#allocation11 + $0x4a0] sm:$0xff]  ;;  %v721_v42 = vld [vmem:[#allocation11 + $0x4b0] sm:$0xff] }
 0x2b4   :  { %v666_v0 = vld [vmem:[#allocation11 + $0x2f8] sm:$0xff]  ;;  %v727_v40 = vld [vmem:[#allocation11 + $0x4e0] sm:$0xff] }
 0x2b5   :  { %1261 = vmatmul.mubr.f32.vlgmr.msra.gmra.mrb[2].mxu1 %v2870_v56  ;;  %1403 = vmatmul.mubr.f32.vlgmr.msra.gmra.mrb[4].mxu0 %v2870_v56  ;;  %v2362_v53 = vpack.c.bf16 %v666_v0, %v658_v45  ;;  %v729_v0 = vld [vmem:[#allocation11 + $0x4f0] sm:$0xff]  ;;  %v2252_v51 = vpack.c.bf16 %v727_v40, %v719_v39  ;;  %v783_v30 = vld [vmem:[#allocation11 + $0x6a0] sm:$0xff]  ;;  %v810_v39 = vld [vmem:[#allocation11 + $0x778] sm:$0xff] }
 0x2b6   :  { %2217 = vmatpush1.bf16.msra.mxu1 %v2216_v55  ;;  %1473 = vmatprep.mubr.f32.mxu1 %v2853_v19  ;;  %v672_v55 = vld [vmem:[#allocation11 + $0x328] sm:$0xff] }
 0x2b7   :  { %2345 = vmatpush1.bf16.msra.mxu0 %v2344_v6  ;;  %1615 = vmatprep.mubr.f32.mxu0 %v2853_v19  ;;  %v623_v19 = vld [vmem:[#allocation11 + $0x1a0] sm:$0xff]  ;;  %v680_v6 = vld [vmem:[#allocation11 + $0x368] sm:$0xff] }
 0x2b8   :  { %2219 = vmatprep.subr.bf16.mxu1 %v2218_v60  ;;  %2347 = vmatprep.subr.bf16.mxu0 %v2346_v61  ;;  %v2228_v31 = vpack.c.bf16 %v631_v22, %v623_v19  ;;  %v2364_v60 = vpack.c.bf16 %v665_v54, %v657_v52  ;;  %v2238_v61 = vpack.c.bf16 %v680_v6, %v672_v55  ;;  %v714_v19 = vld [vmem:[#allocation11 + $0x478] sm:$0xff]  ;;  %v735_v54 = vld [vmem:[#allocation11 + $0x520] sm:$0xff]  ;;  %v737_v6 = vld [vmem:[#allocation11 + $0x530] sm:$0xff] }
 0x2b9   :  { %v2244_v22 = vpack.c.bf16 %v695_v13, %v687_v12  ;;  %v2380_v52 = vpack.c.bf16 %v729_v0, %v721_v42  ;;  %v743_v55 = vld [vmem:[#allocation11 + $0x560] sm:$0xff]  ;;  %v2384_v2 = vpack.c.bf16 %v745_v58, %v737_v6  ;;  %v778_v12 = vld [vmem:[#allocation11 + $0x678] sm:$0xff] }
 0x2ba   :  { %2221 = vmatpush1.bf16.msra.mxu1 %v2220_v5  ;;  %v688_v5 = vld [vmem:[#allocation11 + $0x3a8] sm:$0xff]  ;;  %v2256_v63 = vpack.c.bf16 %v743_v55, %v735_v54  ;;  %v799_v0 = vld [vmem:[#allocation11 + $0x720] sm:$0xff]  ;;  %v826_v54 = vld [vmem:[#allocation11 + $0x7f8] sm:$0xff] }
 0x2bb   :  { %2349 = vmatpush1.bf16.msra.mxu0 %v2348_v7  ;;  %2223 = vmatprep.subr.bf16.mxu1 %v2222_v8  ;;  %v696_v7 = vld [vmem:[#allocation11 + $0x3e8] sm:$0xff]  ;;  %v690_v8 = vld [vmem:[#allocation11 + $0x3b8] sm:$0xff]  ;;  %v815_v58 = vld [vmem:[#allocation11 + $0x7a0] sm:$0xff] }
 0x2bc   :  { %2351 = vmatprep.subr.bf16.mxu0 %v2350_v11  ;;  %v2242_v11 = vpack.c.bf16 %v696_v7, %v688_v5  ;;  %v2370_v16 = vpack.c.bf16 %v698_v41, %v690_v8  ;;  %v759_v5 = vld [vmem:[#allocation11 + $0x5e0] sm:$0xff]  ;;  %v753_v7 = vld [vmem:[#allocation11 + $0x5b0] sm:$0xff] }
 0x2bd   :  { %v761_v41 = vld [vmem:[#allocation11 + $0x5f0] sm:$0xff]  ;;  %v2260_v13 = vpack.c.bf16 %v759_v5, %v751_v4  ;;  %v842_v4 = vld [vmem:[#allocation11 + $0x878] sm:$0xff] }
 0x2be   :  { %2225 = vmatpush1.bf16.msra.mxu1 %v2224_v18  ;;  %v704_v18 = vld [vmem:[#allocation11 + $0x428] sm:$0xff]  ;;  %v2388_v15 = vpack.c.bf16 %v761_v41, %v753_v7  ;;  %v831_v41 = vld [vmem:[#allocation11 + $0x820] sm:$0xff] }
 0x2bf   :  { %2353 = vmatpush1.bf16.msra.mxu0 %v2352_v20  ;;  %2227 = vmatprep.subr.bf16.mxu1 %v2226_v21  ;;  %v712_v20 = vld [vmem:[#allocation11 + $0x468] sm:$0xff]  ;;  %v706_v21 = vld [vmem:[#allocation11 + $0x438] sm:$0xff] }
 0x2c0   :  { %2355 = vmatprep.subr.bf16.mxu0 %v2354_v25  ;;  %v2246_v25 = vpack.c.bf16 %v712_v20, %v704_v18  ;;  %v2374_v29 = vpack.c.bf16 %v714_v19, %v706_v21  ;;  %v775_v18 = vld [vmem:[#allocation11 + $0x660] sm:$0xff]  ;;  %v769_v20 = vld [vmem:[#allocation11 + $0x630] sm:$0xff] }
 0x2c1   :  { %v777_v19 = vld [vmem:[#allocation11 + $0x670] sm:$0xff]  ;;  %v2264_v27 = vpack.c.bf16 %v775_v18, %v767_v17  ;;  %v850_v17 = vld [vmem:[#allocation11 + $0x8b8] sm:$0xff] }
 0x2c2   :  { %2229 = vmatpush1.bf16.msra.mxu1 %v2228_v31  ;;  %v720_v31 = vld [vmem:[#allocation11 + $0x4a8] sm:$0xff]  ;;  %v2392_v28 = vpack.c.bf16 %v777_v19, %v769_v20  ;;  %v858_v18 = vld [vmem:[#allocation11 + $0x8f8] sm:$0xff]  ;;  %v855_v19 = vld [vmem:[#allocation11 + $0x8e0] sm:$0xff] }
 0x2c3   :  { %2357 = vmatpush1.bf16.msra.mxu0 %v2356_v32  ;;  %2231 = vmatprep.subr.bf16.mxu1 %v2230_v34  ;;  %v728_v32 = vld [vmem:[#allocation11 + $0x4e8] sm:$0xff]  ;;  %v722_v34 = vld [vmem:[#allocation11 + $0x4b8] sm:$0xff] }
 0x2c4   :  { %2359 = vmatprep.subr.bf16.mxu0 %v2358_v38  ;;  %v2250_v38 = vpack.c.bf16 %v728_v32, %v720_v31  ;;  %v2378_v45 = vpack.c.bf16 %v730_v35, %v722_v34  ;;  %v791_v31 = vld [vmem:[#allocation11 + $0x6e0] sm:$0xff]  ;;  %v785_v32 = vld [vmem:[#allocation11 + $0x6b0] sm:$0xff] }
 0x2c5   :  { %v793_v35 = vld [vmem:[#allocation11 + $0x6f0] sm:$0xff]  ;;  %v2268_v40 = vpack.c.bf16 %v791_v31, %v783_v30  ;;  %v874_v30 = vld [vmem:[#allocation11 + $0x978] sm:$0xff] }
 0x2c6   :  { %2233 = vmatpush1.bf16.msra.mxu1 %v2232_v47  ;;  %v736_v47 = vld [vmem:[#allocation11 + $0x528] sm:$0xff]  ;;  %v2396_v42 = vpack.c.bf16 %v793_v35, %v785_v32  ;;  %v863_v35 = vld [vmem:[#allocation11 + $0x920] sm:$0xff] }
 0x2c7   :  { %2361 = vmatpush1.bf16.msra.mxu0 %v2360_v48  ;;  %2235 = vmatprep.subr.bf16.mxu1 %v2234_v49  ;;  %v744_v48 = vld [vmem:[#allocation11 + $0x568] sm:$0xff]  ;;  %v738_v49 = vld [vmem:[#allocation11 + $0x538] sm:$0xff] }
 0x2c8   :  { %2363 = vmatprep.subr.bf16.mxu0 %v2362_v53  ;;  %v2254_v53 = vpack.c.bf16 %v744_v48, %v736_v47  ;;  %v2382_v57 = vpack.c.bf16 %v746_v50, %v738_v49  ;;  %v807_v47 = vld [vmem:[#allocation11 + $0x760] sm:$0xff]  ;;  %v801_v48 = vld [vmem:[#allocation11 + $0x730] sm:$0xff] }
 0x2c9   :  { %v809_v50 = vld [vmem:[#allocation11 + $0x770] sm:$0xff]  ;;  %v2272_v55 = vpack.c.bf16 %v807_v47, %v799_v0 }
 0x2ca   :  { %2237 = vmatpush1.bf16.msra.mxu1 %v2236_v59  ;;  %v752_v59 = vld [vmem:[#allocation11 + $0x5a8] sm:$0xff]  ;;  %v2400_v6 = vpack.c.bf16 %v809_v50, %v801_v48  ;;  %v887_v50 = vld [vmem:[#allocation11 + $0x9e0] sm:$0xff] }
 0x2cb   :  { %2365 = vmatpush1.bf16.msra.mxu0 %v2364_v60  ;;  %2239 = vmatprep.subr.bf16.mxu1 %v2238_v61  ;;  %v760_v60 = vld [vmem:[#allocation11 + $0x5e8] sm:$0xff]  ;;  %v754_v61 = vld [vmem:[#allocation11 + $0x5b8] sm:$0xff] }
 0x2cc   :  { %2367 = vmatprep.subr.bf16.mxu0 %v2366_v3  ;;  %v2258_v3 = vpack.c.bf16 %v760_v60, %v752_v59  ;;  %v2386_v8 = vpack.c.bf16 %v762_v62, %v754_v61  ;;  %v823_v59 = vld [vmem:[#allocation11 + $0x7e0] sm:$0xff]  ;;  %v817_v60 = vld [vmem:[#allocation11 + $0x7b0] sm:$0xff] }
 0x2cd   :  { %v825_v62 = vld [vmem:[#allocation11 + $0x7f0] sm:$0xff]  ;;  %v2276_v5 = vpack.c.bf16 %v823_v59, %v815_v58 }
 0x2ce   :  { %2241 = vmatpush1.bf16.msra.mxu1 %v2240_v9  ;;  %v768_v9 = vld [vmem:[#allocation11 + $0x628] sm:$0xff]  ;;  %v2404_v7 = vpack.c.bf16 %v825_v62, %v817_v60  ;;  %v895_v60 = vld [vmem:[#allocation11 + $0xa20] sm:$0xff]  ;;  %v897_v62 = vld [vmem:[#allocation11 + $0xa30] sm:$0xff] }
 0x2cf   :  { %2369 = vmatpush1.bf16.msra.mxu0 %v2368_v10  ;;  %2243 = vmatprep.subr.bf16.mxu1 %v2242_v11  ;;  %v776_v10 = vld [vmem:[#allocation11 + $0x668] sm:$0xff]  ;;  %v770_v11 = vld [vmem:[#allocation11 + $0x638] sm:$0xff] }
 0x2d0   :  { %2371 = vmatprep.subr.bf16.mxu0 %v2370_v16  ;;  %v2262_v16 = vpack.c.bf16 %v776_v10, %v768_v9  ;;  %v2390_v21 = vpack.c.bf16 %v778_v12, %v770_v11  ;;  %v839_v9 = vld [vmem:[#allocation11 + $0x860] sm:$0xff]  ;;  %v833_v11 = vld [vmem:[#allocation11 + $0x830] sm:$0xff] }
 0x2d1   :  { %v841_v12 = vld [vmem:[#allocation11 + $0x870] sm:$0xff] }
 0x2d2   :  { %2245 = vmatpush1.bf16.msra.mxu1 %v2244_v22  ;;  %v784_v22 = vld [vmem:[#allocation11 + $0x6a8] sm:$0xff]  ;;  %v2408_v20 = vpack.c.bf16 %v841_v12, %v833_v11  ;;  %v919_v11 = vld [vmem:[#allocation11 + $0xae0] sm:$0xff]  ;;  %v913_v12 = vld [vmem:[#allocation11 + $0xab0] sm:$0xff] }
 0x2d3   :  { %2373 = vmatpush1.bf16.msra.mxu0 %v2372_v23  ;;  %2247 = vmatprep.subr.bf16.mxu1 %v2246_v25  ;;  %v792_v23 = vld [vmem:[#allocation11 + $0x6e8] sm:$0xff]  ;;  %v786_v25 = vld [vmem:[#allocation11 + $0x6b8] sm:$0xff] }
 0x2d4   :  { %2375 = vmatprep.subr.bf16.mxu0 %v2374_v29  ;;  %v2266_v29 = vpack.c.bf16 %v792_v23, %v784_v22  ;;  %v2394_v34 = vpack.c.bf16 %v794_v26, %v786_v25  ;;  %v849_v22 = vld [vmem:[#allocation11 + $0x8b0] sm:$0xff]  ;;  %v864_v26 = vld [vmem:[#allocation11 + $0x928] sm:$0xff] }
 0x2d5   :  { %v857_v25 = vld [vmem:[#allocation11 + $0x8f0] sm:$0xff] }
 0x2d6   :  { %2249 = vmatpush1.bf16.msra.mxu1 %v2248_v36  ;;  %v800_v36 = vld [vmem:[#allocation11 + $0x728] sm:$0xff]  ;;  %v2412_v32 = vpack.c.bf16 %v857_v25, %v849_v22  ;;  %v935_v25 = vld [vmem:[#allocation11 + $0xb60] sm:$0xff] }
 0x2d7   :  { %2377 = vmatpush1.bf16.msra.mxu0 %v2376_v37  ;;  %2251 = vmatprep.subr.bf16.mxu1 %v2250_v38  ;;  %v808_v37 = vld [vmem:[#allocation11 + $0x768] sm:$0xff]  ;;  %v802_v38 = vld [vmem:[#allocation11 + $0x738] sm:$0xff] }
 0x2d8   :  { %2379 = vmatprep.subr.bf16.mxu0 %v2378_v45  ;;  %v2270_v45 = vpack.c.bf16 %v808_v37, %v800_v36  ;;  %v2398_v49 = vpack.c.bf16 %v810_v39, %v802_v38  ;;  %v871_v36 = vld [vmem:[#allocation11 + $0x960] sm:$0xff]  ;;  %v865_v37 = vld [vmem:[#allocation11 + $0x930] sm:$0xff] }
 0x2d9   :  { %v873_v39 = vld [vmem:[#allocation11 + $0x970] sm:$0xff]  ;;  %v2288_v0 = vpack.c.bf16 %v871_v36, %v863_v35 }
 0x2da   :  { %2253 = vmatpush1.bf16.msra.mxu1 %v2252_v51  ;;  %v816_v51 = vld [vmem:[#allocation11 + $0x7a8] sm:$0xff]  ;;  %v2416_v47 = vpack.c.bf16 %v873_v39, %v865_v37  ;;  %v943_v37 = vld [vmem:[#allocation11 + $0xba0] sm:$0xff]  ;;  %v945_v39 = vld [vmem:[#allocation11 + $0xbb0] sm:$0xff] }
 0x2db   :  { %2381 = vmatpush1.bf16.msra.mxu0 %v2380_v52  ;;  %2255 = vmatprep.subr.bf16.mxu1 %v2254_v53  ;;  %v824_v52 = vld [vmem:[#allocation11 + $0x7e8] sm:$0xff]  ;;  %v818_v53 = vld [vmem:[#allocation11 + $0x7b8] sm:$0xff] }
 0x2dc   :  { %2383 = vmatprep.subr.bf16.mxu0 %v2382_v57  ;;  %v2274_v57 = vpack.c.bf16 %v824_v52, %v816_v51  ;;  %v2402_v61 = vpack.c.bf16 %v826_v54, %v818_v53  ;;  %v881_v51 = vld [vmem:[#allocation11 + $0x9b0] sm:$0xff]  ;;  %v896_v53 = vld [vmem:[#allocation11 + $0xa28] sm:$0xff] }
 0x2dd   :  { %v904_v54 = vld [vmem:[#allocation11 + $0xa68] sm:$0xff] }
 0x2de   :  { %2257 = vmatpush1.bf16.msra.mxu1 %v2256_v63  ;;  %v832_v63 = vld [vmem:[#allocation11 + $0x828] sm:$0xff]  ;;  %v2294_v59 = vpack.c.bf16 %v904_v54, %v896_v53  ;;  %v969_v54 = vld [vmem:[#allocation11 + $0xc70] sm:$0xff] }
 0x2df   :  { %2385 = vmatpush1.bf16.msra.mxu0 %v2384_v2  ;;  %2259 = vmatprep.subr.bf16.mxu1 %v2258_v3  ;;  %v840_v2 = vld [vmem:[#allocation11 + $0x868] sm:$0xff]  ;;  %v834_v3 = vld [vmem:[#allocation11 + $0x838] sm:$0xff] }
 0x2e0   :  { %2387 = vmatprep.subr.bf16.mxu0 %v2386_v8  ;;  %v2278_v8 = vpack.c.bf16 %v840_v2, %v832_v63  ;;  %v2406_v10 = vpack.c.bf16 %v842_v4, %v834_v3  ;;  %v905_v2 = vld [vmem:[#allocation11 + $0xa70] sm:$0xff]  ;;  %v912_v3 = vld [vmem:[#allocation11 + $0xaa8] sm:$0xff] }
 0x2e1   :  { %v920_v4 = vld [vmem:[#allocation11 + $0xae8] sm:$0xff] }
 0x2e2   :  { %2261 = vmatpush1.bf16.msra.mxu1 %v2260_v13  ;;  %v848_v13 = vld [vmem:[#allocation11 + $0x8a8] sm:$0xff] }
 0x2e3   :  { %2389 = vmatpush1.bf16.msra.mxu0 %v2388_v15  ;;  %2263 = vmatprep.subr.bf16.mxu1 %v2262_v16  ;;  %v856_v15 = vld [vmem:[#allocation11 + $0x8e8] sm:$0xff]  ;;  %v2280_v16 = vpack.c.bf16 %v839_v9, %v831_v41  ;;  %v2424_v41 = vpack.c.bf16 %v905_v2, %v897_v62  ;;  %v2298_v9 = vpack.c.bf16 %v920_v4, %v912_v3  ;;  %v975_v62 = vld [vmem:[#allocation11 + $0xca0] sm:$0xff]  ;;  %v977_v2 = vld [vmem:[#allocation11 + $0xcb0] sm:$0xff] }
 0x2e4   :  { %2391 = vmatprep.subr.bf16.mxu0 %v2390_v21  ;;  %v847_v21 = vld [vmem:[#allocation11 + $0x8a0] sm:$0xff]  ;;  %v2282_v23 = vpack.c.bf16 %v856_v15, %v848_v13  ;;  %v921_v15 = vld [vmem:[#allocation11 + $0xaf0] sm:$0xff] }
 0x2e5   :  { %v2284_v31 = vpack.c.bf16 %v855_v19, %v847_v21  ;;  %v2428_v19 = vpack.c.bf16 %v921_v15, %v913_v12  ;;  %v985_v4 = vld [vmem:[#allocation11 + $0xcf0] sm:$0xff]  ;;  %v991_v12 = vld [vmem:[#allocation11 + $0xd20] sm:$0xff] }
 0x2e6   :  { %2265 = vmatpush1.bf16.msra.mxu1 %v2264_v27  ;;  %v872_v27 = vld [vmem:[#allocation11 + $0x968] sm:$0xff]  ;;  %v993_v15 = vld [vmem:[#allocation11 + $0xd30] sm:$0xff] }
 0x2e7   :  { %2393 = vmatpush1.bf16.msra.mxu0 %v2392_v28  ;;  %2267 = vmatprep.subr.bf16.mxu1 %v2266_v29  ;;  %v2410_v28 = vpack.c.bf16 %v858_v18, %v850_v17  ;;  %v866_v29 = vld [vmem:[#allocation11 + $0x938] sm:$0xff]  ;;  %v936_v17 = vld [vmem:[#allocation11 + $0xb68] sm:$0xff] }
 0x2e8   :  { %2395 = vmatprep.subr.bf16.mxu0 %v2394_v34  ;;  %v2286_v34 = vpack.c.bf16 %v872_v27, %v864_v26  ;;  %v2414_v38 = vpack.c.bf16 %v874_v30, %v866_v29  ;;  %v930_v18 = vld [vmem:[#allocation11 + $0xb38] sm:$0xff]  ;;  %v929_v26 = vld [vmem:[#allocation11 + $0xb30] sm:$0xff]  ;;  %v944_v29 = vld [vmem:[#allocation11 + $0xba8] sm:$0xff] }
 0x2e9   :  { %v952_v30 = vld [vmem:[#allocation11 + $0xbe8] sm:$0xff] }
 0x2ea   :  { %2269 = vmatpush1.bf16.msra.mxu1 %v2268_v40  ;;  %v880_v40 = vld [vmem:[#allocation11 + $0x9a8] sm:$0xff]  ;;  %v2306_v36 = vpack.c.bf16 %v952_v30, %v944_v29  ;;  %v1017_v30 = vld [vmem:[#allocation11 + $0xdf0] sm:$0xff] }
 0x2eb   :  { %2397 = vmatpush1.bf16.msra.mxu0 %v2396_v42  ;;  %2271 = vmatprep.subr.bf16.mxu1 %v2270_v45  ;;  %v888_v42 = vld [vmem:[#allocation11 + $0x9e8] sm:$0xff]  ;;  %v882_v45 = vld [vmem:[#allocation11 + $0x9b8] sm:$0xff] }
 0x2ec   :  { %2399 = vmatprep.subr.bf16.mxu0 %v2398_v49  ;;  %v2290_v48 = vpack.c.bf16 %v888_v42, %v880_v40  ;;  %v879_v49 = vld [vmem:[#allocation11 + $0x9a0] sm:$0xff]  ;;  %v953_v42 = vld [vmem:[#allocation11 + $0xbf0] sm:$0xff] }
 0x2ee   :  { %2273 = vmatpush1.bf16.msra.mxu1 %v2272_v55  ;;  %v898_v55 = vld [vmem:[#allocation11 + $0xa38] sm:$0xff] }
 0x2ef   :  { %2401 = vmatpush1.bf16.msra.mxu0 %v2400_v6  ;;  %2275 = vmatprep.subr.bf16.mxu1 %v2274_v57  ;;  %v906_v6 = vld [vmem:[#allocation11 + $0xa78] sm:$0xff]  ;;  %v2292_v57 = vpack.c.bf16 %v887_v50, %v879_v49  ;;  %v2436_v49 = vpack.c.bf16 %v953_v42, %v945_v39  ;;  %v1023_v39 = vld [vmem:[#allocation11 + $0xe20] sm:$0xff]  ;;  %v1025_v42 = vld [vmem:[#allocation11 + $0xe30] sm:$0xff] }
 0x2f0   :  { %2403 = vmatprep.subr.bf16.mxu0 %v2402_v61  ;;  %v903_v61 = vld [vmem:[#allocation11 + $0xa60] sm:$0xff]  ;;  %v2422_v63 = vpack.c.bf16 %v906_v6, %v898_v55  ;;  %v976_v55 = vld [vmem:[#allocation11 + $0xca8] sm:$0xff] }
 0x2f1   :  { %v984_v6 = vld [vmem:[#allocation11 + $0xce8] sm:$0xff] }
 0x2f2   :  { %2277 = vmatpush1.bf16.msra.mxu1 %v2276_v5  ;;  %v914_v5 = vld [vmem:[#allocation11 + $0xab8] sm:$0xff] }
 0x2f3   :  { %2405 = vmatpush1.bf16.msra.mxu0 %v2404_v7  ;;  %2279 = vmatprep.subr.bf16.mxu1 %v2278_v8  ;;  %v922_v7 = vld [vmem:[#allocation11 + $0xaf8] sm:$0xff]  ;;  %v2296_v8 = vpack.c.bf16 %v903_v61, %v895_v60  ;;  %v2314_v61 = vpack.c.bf16 %v984_v6, %v976_v55  ;;  %v1049_v6 = vld [vmem:[#allocation11 + $0xef0] sm:$0xff] }
 0x2f4   :  { %2407 = vmatprep.subr.bf16.mxu0 %v2406_v10  ;;  %v911_v10 = vld [vmem:[#allocation11 + $0xaa0] sm:$0xff]  ;;  %v2426_v13 = vpack.c.bf16 %v922_v7, %v914_v5  ;;  %v992_v5 = vld [vmem:[#allocation11 + $0xd28] sm:$0xff] }
 0x2f5   :  { %1474 = vmatmul.mubr.f32.vlgmr.msra.gmra.mrb[4].mxu1 %v2855_v24  ;;  %v2300_v21 = vpack.c.bf16 %v919_v11, %v911_v10  ;;  %v1000_v7 = vld [vmem:[#allocation11 + $0xd68] sm:$0xff]  ;;  %v2444_v10 = vpack.c.bf16 %v985_v4, %v977_v2  ;;  %v1055_v2 = vld [vmem:[#allocation11 + $0xf20] sm:$0xff]  ;;  %v1057_v4 = vld [vmem:[#allocation11 + $0xf30] sm:$0xff] }
 0x2f6   :  { %1616 = vmatmul.mubr.f32.vlgmr.msra.gmra.mrb[6].mxu0 %v2855_v24  ;;  %2281 = vmatpush1.bf16.msra.mxu1 %v2280_v16  ;;  %v890_v24 = vld [vmem:[#allocation11 + $0x9f8] sm:$0xff]  ;;  %v928_v16 = vld [vmem:[#allocation11 + $0xb28] sm:$0xff]  ;;  %v2318_v11 = vpack.c.bf16 %v1000_v7, %v992_v5  ;;  %v1065_v7 = vld [vmem:[#allocation11 + $0xf70] sm:$0xff] }
 0x2f7   :  { %1544 = vmatprep.mubr.f32.mxu1 %v2859_v33  ;;  %2409 = vmatpush1.bf16.msra.mxu0 %v2408_v20  ;;  %v2418_v52 = vpack.c.bf16 %v890_v24, %v882_v45  ;;  %v938_v20 = vld [vmem:[#allocation11 + $0xb78] sm:$0xff]  ;;  %v2302_v22 = vpack.c.bf16 %v936_v17, %v928_v16  ;;  %v960_v45 = vld [vmem:[#allocation11 + $0xc28] sm:$0xff]  ;;  %v1001_v17 = vld [vmem:[#allocation11 + $0xd70] sm:$0xff] }
 0x2f8   :  { %1686 = vmatprep.mubr.f32.mxu0 %v2859_v33  ;;  %2283 = vmatprep.subr.bf16.mxu1 %v2282_v23  ;;  %v889_v33 = vld [vmem:[#allocation11 + $0x9f0] sm:$0xff]  ;;  %v927_v23 = vld [vmem:[#allocation11 + $0xb20] sm:$0xff]  ;;  %v2430_v27 = vpack.c.bf16 %v938_v20, %v930_v18  ;;  %v968_v24 = vld [vmem:[#allocation11 + $0xc68] sm:$0xff] }
 0x2f9   :  { %2411 = vmatprep.subr.bf16.mxu0 %v2410_v28  ;;  %v2420_v58 = vpack.c.bf16 %v889_v33, %v881_v51  ;;  %v937_v28 = vld [vmem:[#allocation11 + $0xb70] sm:$0xff]  ;;  %v2310_v50 = vpack.c.bf16 %v968_v24, %v960_v45  ;;  %v959_v51 = vld [vmem:[#allocation11 + $0xc20] sm:$0xff]  ;;  %v1008_v18 = vld [vmem:[#allocation11 + $0xda8] sm:$0xff] }
 0x2fa   :  { %2285 = vmatpush1.bf16.msra.mxu1 %v2284_v31  ;;  %v946_v31 = vld [vmem:[#allocation11 + $0xbb8] sm:$0xff]  ;;  %v2432_v35 = vpack.c.bf16 %v937_v28, %v929_v26  ;;  %v961_v33 = vld [vmem:[#allocation11 + $0xc30] sm:$0xff]  ;;  %v1016_v20 = vld [vmem:[#allocation11 + $0xde8] sm:$0xff] }
 0x2fb   :  { %2413 = vmatpush1.bf16.msra.mxu0 %v2412_v32  ;;  %2287 = vmatprep.subr.bf16.mxu1 %v2286_v34  ;;  %v954_v32 = vld [vmem:[#allocation11 + $0xbf8] sm:$0xff]  ;;  %v2304_v34 = vpack.c.bf16 %v935_v25, %v927_v23  ;;  %v2440_v60 = vpack.c.bf16 %v969_v54, %v961_v33  ;;  %v2448_v23 = vpack.c.bf16 %v1001_v17, %v993_v15  ;;  %v1007_v26 = vld [vmem:[#allocation11 + $0xda0] sm:$0xff]  ;;  %v1009_v28 = vld [vmem:[#allocation11 + $0xdb0] sm:$0xff] }
 0x2fc   :  { %2415 = vmatprep.subr.bf16.mxu0 %v2414_v38  ;;  %v951_v38 = vld [vmem:[#allocation11 + $0xbe0] sm:$0xff]  ;;  %v2434_v40 = vpack.c.bf16 %v954_v32, %v946_v31  ;;  %v2322_v25 = vpack.c.bf16 %v1016_v20, %v1008_v18  ;;  %v1024_v31 = vld [vmem:[#allocation11 + $0xe28] sm:$0xff]  ;;  %v1033_v24 = vld [vmem:[#allocation11 + $0xe70] sm:$0xff] }
 0x2fd   :  { %v1032_v32 = vld [vmem:[#allocation11 + $0xe68] sm:$0xff]  ;;  %v1039_v33 = vld [vmem:[#allocation11 + $0xea0] sm:$0xff]  ;;  %v1041_v54 = vld [vmem:[#allocation11 + $0xeb0] sm:$0xff] }
 0x2fe   :  { %2289 = vmatpush1.bf16.msra.mxu1 %v2288_v0  ;;  %v962_v0 = vld [vmem:[#allocation11 + $0xc38] sm:$0xff]  ;;  %v1071_v15 = vld [vmem:[#allocation11 + $0xfa0] sm:$0xff]  ;;  %v1073_v18 = vld [vmem:[#allocation11 + $0xfb0] sm:$0xff] }
 0x2ff   :  { %2417 = vmatpush1.bf16.msra.mxu0 %v2416_v47  ;;  %2291 = vmatprep.subr.bf16.mxu1 %v2290_v48  ;;  %v970_v47 = vld [vmem:[#allocation11 + $0xc78] sm:$0xff]  ;;  %v2308_v48 = vpack.c.bf16 %v951_v38, %v943_v37  ;;  %v2452_v37 = vpack.c.bf16 %v1017_v30, %v1009_v28  ;;  %v2326_v38 = vpack.c.bf16 %v1032_v32, %v1024_v31  ;;  %v1081_v20 = vld [vmem:[#allocation11 + $0xff0] sm:$0xff] }
 0x300   :  { %2419 = vmatprep.subr.bf16.mxu0 %v2418_v52  ;;  %v967_v52 = vld [vmem:[#allocation11 + $0xc60] sm:$0xff]  ;;  %v2438_v53 = vpack.c.bf16 %v970_v47, %v962_v0  ;;  %v1040_v0 = vld [vmem:[#allocation11 + $0xea8] sm:$0xff] }
 0x301   :  { %v1048_v47 = vld [vmem:[#allocation11 + $0xee8] sm:$0xff] }
 0x302   :  { %2293 = vmatpush1.bf16.msra.mxu1 %v2292_v57  ;;  %v978_v57 = vld [vmem:[#allocation11 + $0xcb8] sm:$0xff] }
 0x303   :  { %2421 = vmatpush1.bf16.msra.mxu0 %v2420_v58  ;;  %2295 = vmatprep.subr.bf16.mxu1 %v2294_v59  ;;  %v986_v58 = vld [vmem:[#allocation11 + $0xcf8] sm:$0xff]  ;;  %v2312_v59 = vpack.c.bf16 %v967_v52, %v959_v51  ;;  %v2456_v51 = vpack.c.bf16 %v1033_v24, %v1025_v42  ;;  %v2330_v52 = vpack.c.bf16 %v1048_v47, %v1040_v0  ;;  %v1103_v47 = vsub.s32 4, %v2831_v43 }
 0x304   :  { %2423 = vmatprep.subr.bf16.mxu0 %v2422_v63  ;;  %v983_v63 = vld [vmem:[#allocation11 + $0xce0] sm:$0xff]  ;;  %v2442_v3 = vpack.c.bf16 %v986_v58, %v978_v57  ;;  %v1056_v57 = vld [vmem:[#allocation11 + $0xf28] sm:$0xff] }
 0x305   :  { %v1064_v58 = vld [vmem:[#allocation11 + $0xf68] sm:$0xff] }
 0x306   :  { %2297 = vmatpush1.bf16.msra.mxu1 %v2296_v8  ;;  %v994_v8 = vld [vmem:[#allocation11 + $0xd38] sm:$0xff] }
 0x307   :  { %2425 = vmatpush1.bf16.msra.mxu0 %v2424_v41  ;;  %2299 = vmatprep.subr.bf16.mxu1 %v2298_v9  ;;  %v1002_v41 = vld [vmem:[#allocation11 + $0xd78] sm:$0xff]  ;;  %v2316_v9 = vpack.c.bf16 %v983_v63, %v975_v62  ;;  %v2460_v62 = vpack.c.bf16 %v1049_v6, %v1041_v54  ;;  %v2334_v63 = vpack.c.bf16 %v1064_v58, %v1056_v57 }
 0x308   :  { %2427 = vmatprep.subr.bf16.mxu0 %v2426_v13  ;;  %v999_v13 = vld [vmem:[#allocation11 + $0xd60] sm:$0xff]  ;;  %v2446_v16 = vpack.c.bf16 %v1002_v41, %v994_v8  ;;  %v1072_v8 = vld [vmem:[#allocation11 + $0xfa8] sm:$0xff] }
 0x309   :  { %v1080_v41 = vld [vmem:[#allocation11 + $0xfe8] sm:$0xff] }
 0x30a   :  { %2301 = vmatpush1.bf16.msra.mxu1 %v2300_v21  ;;  %v1010_v21 = vld [vmem:[#allocation11 + $0xdb8] sm:$0xff] }
 0x30b   :  { %2429 = vmatpush1.bf16.msra.mxu0 %v2428_v19  ;;  %2303 = vmatprep.subr.bf16.mxu1 %v2302_v22  ;;  %v1018_v19 = vld [vmem:[#allocation11 + $0xdf8] sm:$0xff]  ;;  %v2320_v22 = vpack.c.bf16 %v999_v13, %v991_v12  ;;  %v2464_v12 = vpack.c.bf16 %v1065_v7, %v1057_v4  ;;  %v2338_v13 = vpack.c.bf16 %v1080_v41, %v1072_v8 }
 0x30c   :  { %2431 = vmatprep.subr.bf16.mxu0 %v2430_v27  ;;  %v1015_v27 = vld [vmem:[#allocation11 + $0xde0] sm:$0xff]  ;;  %v2450_v29 = vpack.c.bf16 %v1018_v19, %v1010_v21  ;;  %v2468_v19 = vpack.c.bf16 %v1081_v20, %v1073_v18 }
 0x30e   :  { %2305 = vmatpush1.bf16.msra.mxu1 %v2304_v34  ;;  %v1026_v34 = vld [vmem:[#allocation11 + $0xe38] sm:$0xff] }
 0x30f   :  { %2433 = vmatpush1.bf16.msra.mxu0 %v2432_v35  ;;  %2307 = vmatprep.subr.bf16.mxu1 %v2306_v36  ;;  %v1034_v35 = vld [vmem:[#allocation11 + $0xe78] sm:$0xff]  ;;  %v2324_v36 = vpack.c.bf16 %v1015_v27, %v1007_v26 }
 0x310   :  { %2435 = vmatprep.subr.bf16.mxu0 %v2434_v40  ;;  %v1031_v40 = vld [vmem:[#allocation11 + $0xe60] sm:$0xff]  ;;  %v2454_v45 = vpack.c.bf16 %v1034_v35, %v1026_v34 }
 0x312   :  { %2309 = vmatpush1.bf16.msra.mxu1 %v2308_v48  ;;  %v1042_v48 = vld [vmem:[#allocation11 + $0xeb8] sm:$0xff] }
 0x313   :  { %2437 = vmatpush1.bf16.msra.mxu0 %v2436_v49  ;;  %2311 = vmatprep.subr.bf16.mxu1 %v2310_v50  ;;  %v1050_v49 = vld [vmem:[#allocation11 + $0xef8] sm:$0xff]  ;;  %v2328_v50 = vpack.c.bf16 %v1031_v40, %v1023_v39 }
 0x314   :  { %2439 = vmatprep.subr.bf16.mxu0 %v2438_v53  ;;  %v1047_v53 = vld [vmem:[#allocation11 + $0xee0] sm:$0xff]  ;;  %v2458_v55 = vpack.c.bf16 %v1050_v49, %v1042_v48  ;;  %v1111_v48 = vsub.s32 6, %v2831_v43  ;;  %v1107_v49 = vsub.s32 5, %v2831_v43 }
 0x316   :  { %2313 = vmatpush1.bf16.msra.mxu1 %v2312_v59  ;;  %v1058_v59 = vld [vmem:[#allocation11 + $0xf38] sm:$0xff] }
 0x317   :  { %2441 = vmatpush1.bf16.msra.mxu0 %v2440_v60  ;;  %2315 = vmatprep.subr.bf16.mxu1 %v2314_v61  ;;  %v1066_v60 = vld [vmem:[#allocation11 + $0xf78] sm:$0xff]  ;;  %v2332_v61 = vpack.c.bf16 %v1047_v53, %v1039_v33 }
 0x318   :  { %2443 = vmatprep.subr.bf16.mxu0 %v2442_v3  ;;  %v1063_v3 = vld [vmem:[#allocation11 + $0xf60] sm:$0xff]  ;;  %v2462_v5 = vpack.c.bf16 %v1066_v60, %v1058_v59 }
 0x31a   :  { %2317 = vmatpush1.bf16.msra.mxu1 %v2316_v9  ;;  %v1074_v9 = vld [vmem:[#allocation11 + $0xfb8] sm:$0xff] }
 0x31b   :  { %2445 = vmatpush1.bf16.msra.mxu0 %v2444_v10  ;;  %2319 = vmatprep.subr.bf16.mxu1 %v2318_v11  ;;  %v1082_v10 = vld [vmem:[#allocation11 + $0xff8] sm:$0xff]  ;;  %v2336_v11 = vpack.c.bf16 %v1063_v3, %v1055_v2 }
 0x31c   :  { %2447 = vmatprep.subr.bf16.mxu0 %v2446_v16  ;;  %v1079_v16 = vld [vmem:[#allocation11 + $0xfe0] sm:$0xff]  ;;  %v2466_v17 = vpack.c.bf16 %v1082_v10, %v1074_v9 }
 0x31d   :  { %v2340_v21 = vpack.c.bf16 %v1079_v16, %v1071_v15 }
 0x31e   :  { %2321 = vmatpush1.bf16.msra.mxu1 %v2320_v22  ;;  %v1083_v22 = vld [vmem:[#allocation13] sm:$0xff] }
 0x31f   :  { %2449 = vmatpush1.bf16.msra.mxu0 %v2448_v23  ;;  %2323 = vmatprep.subr.bf16.mxu1 %v2322_v25  ;;  %v2700_v23 = vmov 1983009808   ;;  %v1088_v26 = vrot.slane %v1083_v22, %v2834_v44  ;;  %v1096_v27 = vrot.slane %v1083_v22, %v415_v14  ;;  %v1092_v28 = vrot.slane %v1083_v22, %v2837_v46 }
 0x320   :  { %2451 = vmatprep.subr.bf16.mxu0 %v2450_v29  ;;  %v1712_v25 = vunpack.c.l.s4 %v2700_v23  ;;  %v1100_v29 = vrot.slane %v1083_v22, %v419_v1  ;;  %v1108_v33 = vrot.slane %v1083_v22, %v1107_v49 }
 0x322   :  { %2325 = vmatpush1.bf16.msra.mxu1 %v2324_v36  ;;  %v1713_v32 = vunpack.c.0.s8 %v1712_v25 }
 0x323   :  { %2453 = vmatpush1.bf16.msra.mxu0 %v2452_v37  ;;  %2327 = vmatprep.subr.bf16.mxu1 %v2326_v38 }
 0x324   :  { %2455 = vmatprep.subr.bf16.mxu0 %v2454_v45  ;;  %v1716_v42 = vsub.s32 %v1713_v32, %v2831_v43 }
 0x326   :  { %2329 = vmatpush1.bf16.msra.mxu1 %v2328_v50  ;;  %v1115_v50 = vsub.s32 7, %v2831_v43 }
 0x327   :  { %2457 = vmatpush1.bf16.msra.mxu0 %v2456_v51  ;;  %2331 = vmatprep.subr.bf16.mxu1 %v2330_v52  ;;  %v1104_v51 = vrot.slane %v1083_v22, %v1103_v47  ;;  %v1112_v52 = vrot.slane %v1083_v22, %v1111_v48 }
 0x328   :  { %2459 = vmatprep.subr.bf16.mxu0 %v2458_v55  ;;  %v1116_v53 = vrot.slane %v1083_v22, %v1115_v50 }
 0x32a   :  { %2333 = vmatpush1.bf16.msra.mxu1 %v2332_v61 }
 0x32b   :  { %2461 = vmatpush1.bf16.msra.mxu0 %v2460_v62  ;;  %2335 = vmatprep.subr.bf16.mxu1 %v2334_v63 }
 0x32c   :  { %2463 = vmatprep.subr.bf16.mxu0 %v2462_v5 }
 0x32e   :  { %2337 = vmatpush1.bf16.msra.mxu1 %v2336_v11 }
 0x32f   :  { %2465 = vmatpush1.bf16.msra.mxu0 %v2464_v12  ;;  %2339 = vmatprep.subr.bf16.mxu1 %v2338_v13 }
 0x330   :  { %2467 = vmatprep.subr.bf16.mxu0 %v2466_v17 }
 0x332   :  { %2341 = vmatpush1.bf16.msra.mxu1 %v2340_v21 }
 0x333   :  { %2469 = vmatpush1.bf16.msra.mxu0 %v2468_v19 }
 0x335   :  { %1545 = vmatmul.mubr.f32.vlgmr.msra.gmra.mrb[4].mxu1 %v2870_v56 }
 0x336   :  { %1687 = vmatmul.mubr.f32.vlgmr.msra.gmra.mrb[6].mxu0 %v2870_v56 }
 0x388   :  { %v1262_v30 = vpop.f32.mrb[2].mxu1  ;;  %v1404_v31 = vpop.f32.mrb[4].mxu0 }
 0x389   :  { %v2470_v34 = vadd.f32 %v1262_v30, %v1088_v26  ;;  %v2472_v35 = vadd.f32 %v1404_v31, %v1096_v27  ;;  %v1264_v36 = vpop.f32.mrb[3].mxu1  ;;  %v1406_v56 = vpop.f32.mrb[5].mxu0 }
 0x38a   :  { %v2471_v37 = vadd.f32 %v1264_v36, %v1092_v28  ;;  %v2473_v38 = vadd.f32 %v1406_v56, %v1100_v29 }
 0x38b   :  { %v1693_v39 = vmax.f32 %v2470_v34, 0.0  ;;  %v1695_v40 = vmax.f32 %v2472_v35, 0.0 }
 0x38c   :  { %v1694_v44 = vmax.f32 %v2471_v37, 0.0  ;;  %v1696_v14 = vmax.f32 %v2473_v38, 0.0 }
 0x38e   :  { %v1709_v45 = vcombine.low %v1693_v39, %v1694_v44  ;;  %v1710_v46 = vcombine.low %v1695_v40, %v1696_v14 }
 0x390   :  { %v1717_v24 = vrot.slane %v1709_v45, %v1716_v42  ;;  %v1724_v0 = vrot.slane %v1710_v46, %v1716_v42 }
 0x392   :  { %v1725_v1 = vcombine.low %v1717_v24, %v1724_v0 }
 0x394   :  { %1745 = vst [vmem:[#allocation14] sm:$0xff] %v1725_v1 }
 0x408   :  { %v1546_v54 = vpop.f32.mrb[4].mxu1 }
 0x409   :  { %v2474_v55 = vadd.f32 %v1546_v54, %v1104_v51  ;;  %v1688_v6 = vpop.f32.mrb[6].mxu0  ;;  %v1548_v57 = vpop.f32.mrb[5].mxu1 }
 0x40a   :  { %v2476_v58 = vadd.f32 %v1688_v6, %v1112_v52  ;;  %v2475_v59 = vadd.f32 %v1548_v57, %v1108_v33  ;;  %v1690_v60 = vpop.f32.mrb[7].mxu0 }
 0x40b   :  { %v1697_v61 = vmax.f32 %v2474_v55, 0.0  ;;  %v2477_v62 = vadd.f32 %v1690_v60, %v1116_v53 }
 0x40c   :  { %v1699_v63 = vmax.f32 %v2476_v58, 0.0  ;;  %v1698_v2 = vmax.f32 %v2475_v59, 0.0 }
 0x40d   :  { %v1700_v3 = vmax.f32 %v2477_v62, 0.0 }
 0x40e   :  { %v1726_v4 = vcombine.low %v1697_v61, %v1698_v2 }
 0x40f   :  { %v1727_v5 = vcombine.low %v1699_v63, %v1700_v3 }
 0x410   :  { %v1734_v7 = vrot.slane %v1726_v4, %v1716_v42 }
 0x411   :  { %v1741_v43 = vrot.slane %v1727_v5, %v1716_v42 }
 0x413   :  { %v1742_v8 = vcombine.low %v1734_v7, %v1741_v43 }
 0x415   :  { %1746 = vst [vmem:[#allocation14 + $0x8] sm:$0xff] %v1742_v8 }
 0x416   :  { %2666 = shalt.err (!%p2663_p4)
}
 0x417   :  { %s2667_s3 = scalar_lea.hbm %s2912_s7, 256 }
 0x418   :  { %p2668_p5 = scmp.ne.s32.totalorder %s2912_s7, %s2667_s3  ;;  %p2671_p6 = scmp.lt.u32.totalorder %s2667_s3, %s2912_s7 }
 0x41a   :  { %p2673_p7 = pnand %p2671_p6, %p2668_p5 }
 0x41c   :  { %2676 = shalt.err (!%p2673_p7)
}
 0x41d   :  { %1756 = dma.vmem_to_hbm [thread:$0]  %s1754_s12, 256, %s2912_s7, [#allocation4]  }
 0x41e   :  { %2685 = dma.done.wait [#allocation4], 256  }
 0x41f   :  { %2686 = vsyncadd [#allocation4], 4294967040 }
 0x420   :  { %1760 = vsyncpa [#allocation3], 1 }
 0x421   :  { %1761 = vsyncpa [#allocation6], 1 }
 0x422   :  { %1762 = vsyncpa [#allocation9], 1 }
 0x423   :  { %1763 = vsyncpa [#allocation12], 1 }
 0x424   :  { %1764 = vsyncpa [#allocation4], 1 }

</bundles_post_ra>
